<compile_context>
chip_gen: v7x
topology: tpu7x:2x2x1
jax: 0.10.0
libtpu: 0.0.40
codegen_flags: <defaults>
</compile_context>

<pallas_src>
import math

import jax
import jax.numpy as jnp
from jax.experimental import pallas as pl
from jax.experimental.pallas import tpu as pltpu

# ----------------------- small hyperparameters (consistent with the module) ----------
B = 2                      # batch
S = 8                      # args.max_seq_len (= BertConfig.max_position_embeddings)
HID = 48                   # args.hidden_dim
INTD = HID // 3            # 16
N_HEADS = 4                # args.n_heads
HEAD_DIM = HID // N_HEADS  # 12
N_LAYERS = 2               # args.n_layers
INTER = 3072               # HF BertConfig default intermediate_size
LN_EPS = 1e-12             # HF BertConfig default layer_norm_eps
N_TEST = 10
N_QUESTIONS = 20
N_TAG = 7
N_ELAPSED = 5
INIT_STD = 0.02
BS = B * S

TILE_I = 512               # FFN intermediate chunk width
N_CHUNKS = INTER // TILE_I # 6


# ----------------------------- in-kernel helpers (traced) ----------------------------
def _layernorm(x, g, b, eps=LN_EPS):
    mu = jnp.mean(x, axis=-1, keepdims=True)
    var = jnp.mean((x - mu) ** 2, axis=-1, keepdims=True)
    return (x - mu) * jax.lax.rsqrt(var + eps) * g + b


def _gelu_tanh(x):
    c = math.sqrt(2.0 / math.pi)
    return 0.5 * x * (1.0 + jnp.tanh(c * (x + 0.044715 * x * x * x)))


# --------------------------------- fused Pallas kernel --------------------------------
def fused_bert_kernel(e_ref, bias_ref,
                      cw_ref, cb_ref, pos_ref, tok_ref, eg_ref, eb_ref,
                      wq_ref, bq_ref, wk_ref, bk_ref, wv_ref, bv_ref,
                      wo_ref, bo_ref, g1_ref, be1_ref,
                      wi_ref, bi_ref, w2_ref, b2_ref, g2_ref, be2_ref,
                      fcw_ref, fcb_ref,
                      o_ref,
                      x_sc, h1_sc, acc_sc):
    l = pl.program_id(0)
    c = pl.program_id(1)
    last_chunk = c == pl.num_programs(1) - 1
    last_layer = l == pl.num_programs(0) - 1

    # ---- BaseModel.comb_proj + BertEmbeddings (pos + token_type 0) + LN: first step only
    @pl.when((l == 0) & (c == 0))
    def _():
        h = jnp.dot(e_ref[...], cw_ref[...],
                    preferred_element_type=jnp.float32) + cb_ref[...]
        h = h + pos_ref[...] + tok_ref[...]          # pos already tiled to (B*S, HID)
        x_sc[...] = _layernorm(h, eg_ref[...], eb_ref[...])

    # ---- self-attention block: once per layer (chunk 0) -------------------------------
    @pl.when(c == 0)
    def _():
        x = x_sc[...]
        bias = bias_ref[...]                          # (B*S, B*S) additive mask
        attn = None
        for hh in range(N_HEADS):                     # static unroll; leading-dim index is free
            qh = jnp.dot(x, wq_ref[hh], preferred_element_type=jnp.float32) + bq_ref[hh]
            kh = jnp.dot(x, wk_ref[hh], preferred_element_type=jnp.float32) + bk_ref[hh]
            vh = jnp.dot(x, wv_ref[hh], preferred_element_type=jnp.float32) + bv_ref[hh]
            s = jax.lax.dot_general(qh, kh, (((1,), (1,)), ((), ())),
                                    preferred_element_type=jnp.float32)  # (B*S, B*S)
            s = s + bias
            s = s - jnp.max(s, axis=-1, keepdims=True)
            p = jnp.exp(s)
            p = p / jnp.sum(p, axis=-1, keepdims=True)
            ctx_h = jnp.dot(p, vh, preferred_element_type=jnp.float32)   # (B*S, HEAD_DIM)
            term = jnp.dot(ctx_h, wo_ref[hh], preferred_element_type=jnp.float32)
            attn = term if attn is None else attn + term
        attn = attn + bo_ref[...]
        h1_sc[...] = _layernorm(attn + x, g1_ref[...], be1_ref[...])
        acc_sc[...] = jnp.zeros_like(acc_sc)

    # ---- FFN chunk: every step (bf16 weight stream, f32 accumulation) -----------------
    h1 = h1_sc[...]
    inter_c = jnp.dot(h1.astype(jnp.bfloat16), wi_ref[...],
                      preferred_element_type=jnp.float32) + bi_ref[...]   # (B*S, TILE_I)
    inter_c = _gelu_tanh(inter_c)
    acc_sc[...] += jnp.dot(inter_c.astype(jnp.bfloat16), w2_ref[...],
                           preferred_element_type=jnp.float32)

    # ---- FFN finalize + residual + LN2: last chunk of each layer ----------------------
    @pl.when(last_chunk)
    def _():
        ffn = acc_sc[...] + b2_ref[...]
        x_sc[...] = _layernorm(ffn + h1_sc[...], g2_ref[...], be2_ref[...])

    # ---- Bert head: fc (hid -> 1) + sigmoid, last grid step only ----------------------
    @pl.when(last_chunk & last_layer)
    def _():
        xf = x_sc[...]
        logit = jnp.sum(xf * fcw_ref[...], axis=-1, keepdims=True) + fcb_ref[...]
        o_ref[...] = jax.nn.sigmoid(logit)


def bert_fused(e, bias, p):
    # Constant-in-grid blocks stay VMEM-resident (fetched once); per-layer blocks are
    # re-fetched once per layer; wi/bi/w2 chunks are double-buffered by the pipeline.
    def per_layer(shape):
        return pl.BlockSpec((None,) + shape, lambda l, c: (l,) + (0,) * len(shape))

    in_specs = [
        pl.BlockSpec((BS, 5 * INTD), lambda l, c: (0, 0)),            # e
        pl.BlockSpec((BS, BS), lambda l, c: (0, 0)),                  # bias
        pl.BlockSpec((5 * INTD, HID), lambda l, c: (0, 0)),           # comb_w
        pl.BlockSpec((1, HID), lambda l, c: (0, 0)),                  # comb_b
        pl.BlockSpec((BS, HID), lambda l, c: (0, 0)),                 # pos_emb (tiled)
        pl.BlockSpec((1, HID), lambda l, c: (0, 0)),                  # tok_emb0
        pl.BlockSpec((1, HID), lambda l, c: (0, 0)),                  # emb_ln_g
        pl.BlockSpec((1, HID), lambda l, c: (0, 0)),                  # emb_ln_b
        per_layer((N_HEADS, HID, HEAD_DIM)),                          # wq
        per_layer((N_HEADS, 1, HEAD_DIM)),                            # bq
        per_layer((N_HEADS, HID, HEAD_DIM)),                          # wk
        per_layer((N_HEADS, 1, HEAD_DIM)),                            # bk
        per_layer((N_HEADS, HID, HEAD_DIM)),                          # wv
        per_layer((N_HEADS, 1, HEAD_DIM)),                            # bv
        per_layer((N_HEADS, HEAD_DIM, HID)),                          # wo (per-head split)
        per_layer((1, HID)),                                          # bo
        per_layer((1, HID)),                                          # ln1_g
        per_layer((1, HID)),                                          # ln1_b
        pl.BlockSpec((None, HID, TILE_I), lambda l, c: (l, 0, c)),    # wi (bf16, streamed)
        pl.BlockSpec((None, 1, TILE_I), lambda l, c: (l, 0, c)),      # bi (streamed)
        pl.BlockSpec((None, TILE_I, HID), lambda l, c: (l, c, 0)),    # w2 (bf16, streamed)
        per_layer((1, HID)),                                          # b2
        per_layer((1, HID)),                                          # ln2_g
        per_layer((1, HID)),                                          # ln2_b
        pl.BlockSpec((1, HID), lambda l, c: (0, 0)),                  # fc_w
        pl.BlockSpec((1, 1), lambda l, c: (0, 0)),                    # fc_b
    ]

    return pl.pallas_call(
        fused_bert_kernel,
        out_shape=jax.ShapeDtypeStruct((BS, 1), jnp.float32),
        grid_spec=pltpu.PrefetchScalarGridSpec(
            num_scalar_prefetch=0,
            grid=(N_LAYERS, N_CHUNKS),
            in_specs=in_specs,
            out_specs=pl.BlockSpec((BS, 1), lambda l, c: (0, 0)),
            scratch_shapes=[
                pltpu.VMEM((BS, HID), jnp.float32),   # x (residual stream)
                pltpu.VMEM((BS, HID), jnp.float32),   # h1 (post-attention LN)
                pltpu.VMEM((BS, HID), jnp.float32),   # FFN accumulator
            ]),
        compiler_params=pltpu.CompilerParams(
            dimension_semantics=("arbitrary", "arbitrary")),
    )(e, bias,
      p["comb_w"], p["comb_b"], p["pos_emb"], p["tok_emb0"], p["emb_ln_g"], p["emb_ln_b"],
      p["wq"], p["bq"], p["wk"], p["bk"], p["wv"], p["bv"],
      p["wo"], p["bo"], p["ln1_g"], p["ln1_b"],
      p["wi"], p["bi"], p["w2"], p["b2"], p["ln2_g"], p["ln2_b"],
      p["fc_w"], p["fc_b"])


# --------------------------------- parameters -----------------------------------------
def init_params(key):
    keys = iter(jax.random.split(key, 64))

    def nrm(shape):
        return INIT_STD * jax.random.normal(next(keys), shape, jnp.float32)

    params = {
        "emb_interaction": nrm((3, INTD)),
        "emb_test": nrm((N_TEST + 1, INTD)),
        "emb_question": nrm((N_QUESTIONS + 1, INTD)),
        "emb_tag": nrm((N_TAG + 1, INTD)),
        "emb_elapsed": nrm((N_ELAPSED + 1, INTD)),
        "comb_w": nrm((5 * INTD, HID)),
        "comb_b": jnp.zeros((1, HID), jnp.float32),
        # position embeddings pre-tiled over the batch (B*S, HID) -> no in-kernel concat.
        "pos_emb": jnp.tile(nrm((S, HID)), (B, 1)),
        "tok_emb0": nrm((1, HID)),           # token_type_embeddings row 0
        "emb_ln_g": jnp.ones((1, HID), jnp.float32),
        "emb_ln_b": jnp.zeros((1, HID), jnp.float32),
        "fc_w": nrm((1, HID)),               # row-vector form for in-kernel VPU reduce
        "fc_b": jnp.zeros((1, 1), jnp.float32),
    }

    scale = 1.0 / math.sqrt(HEAD_DIM)

    def stack(shape):
        return jnp.stack([nrm(shape) for _ in range(N_LAYERS)], axis=0)

    # Per-head split on a leading axis (avoids unaligned lane slices in the kernel).
    def split_heads_in(w):      # (L, HID, HID) -> (L, H, HID, HEAD_DIM)
        return w.reshape(N_LAYERS, HID, N_HEADS, HEAD_DIM).transpose(0, 2, 1, 3)

    def split_heads_out(w):     # (L, HID, HID) -> (L, H, HEAD_DIM, HID)
        return w.reshape(N_LAYERS, N_HEADS, HEAD_DIM, HID)

    params.update({
        # attention 1/sqrt(head_dim) scale folded into the query projection (W and b).
        # NOTE: anyone loading pretrained weights must scale the query bias too.
        "wq": split_heads_in(scale * stack((HID, HID))),
        "bq": scale * jnp.zeros((N_LAYERS, N_HEADS, 1, HEAD_DIM), jnp.float32),
        "wk": split_heads_in(stack((HID, HID))),
        "bk": jnp.zeros((N_LAYERS, N_HEADS, 1, HEAD_DIM), jnp.float32),
        "wv": split_heads_in(stack((HID, HID))),
        "bv": jnp.zeros((N_LAYERS, N_HEADS, 1, HEAD_DIM), jnp.float32),
        "wo": split_heads_out(stack((HID, HID))),
        "bo": jnp.zeros((N_LAYERS, 1, HID), jnp.float32),
        "ln1_g": jnp.ones((N_LAYERS, 1, HID), jnp.float32),
        "ln1_b": jnp.zeros((N_LAYERS, 1, HID), jnp.float32),
        "wi": stack((HID, INTER)).astype(jnp.bfloat16),   # bf16-streamed FFN weights
        "bi": jnp.zeros((N_LAYERS, 1, INTER), jnp.float32),
        "w2": stack((INTER, HID)).astype(jnp.bfloat16),
        "b2": jnp.zeros((N_LAYERS, 1, HID), jnp.float32),
        "ln2_g": jnp.ones((N_LAYERS, 1, HID), jnp.float32),
        "ln2_b": jnp.zeros((N_LAYERS, 1, HID), jnp.float32),
    })
    return params


# --------------------------------- full forward ---------------------------------------
@jax.jit
def bert_forward(params, test, question, tag, elapsed_question, mask, interaction):
    # BaseModel.forward: embedding lookups + concat (gathers done in XLA; dropout = id).
    e = jnp.concatenate([
        params["emb_interaction"][interaction],
        params["emb_test"][test],
        params["emb_question"][question],
        params["emb_tag"][tag],
        params["emb_elapsed"][elapsed_question],
    ], axis=-1).reshape(BS, 5 * INTD)                     # (B*S, 5*INTD)

    # Combined additive attention bias over the flattened token axis:
    # HF key-padding mask ((1-mask)*-10000) + block-diagonal batch mask.  The -10000
    # entries underflow to exactly 0 after the max-subtracted softmax, matching
    # per-batch HF attention (whenever a row has at least one valid key).
    batch_ids = jnp.repeat(jnp.arange(B), S)              # (B*S,)
    same_batch = batch_ids[:, None] == batch_ids[None, :]
    key_valid = mask.reshape(BS) > 0.5
    bias = jnp.where(same_batch & key_valid[None, :], 0.0, -10000.0).astype(jnp.float32)

    preds = bert_fused(e, bias, params)                   # (B*S, 1)
    return preds.reshape(B, S)


if __name__ == "__main__":
    key = jax.random.PRNGKey(0)
    pkey, ikey = jax.random.split(key)
    params = init_params(pkey)

    ks = jax.random.split(ikey, 5)
    test = jax.random.randint(ks[0], (B, S), 1, N_TEST + 1)
    question = jax.random.randint(ks[1], (B, S), 1, N_QUESTIONS + 1)
    tag = jax.random.randint(ks[2], (B, S), 1, N_TAG + 1)
    elapsed_question = jax.random.randint(ks[3], (B, S), 1, N_ELAPSED + 1)
    interaction = jax.random.randint(ks[4], (B, S), 0, 3)
    valid_lens = jnp.array([S, S - 3])
    mask = (jnp.arange(S)[None, :] < valid_lens[:, None]).astype(jnp.float32)

    preds = bert_forward(params, test, question, tag, elapsed_question, mask, interaction)
    jax.block_until_ready(preds)
    assert preds.shape == (B, S) and preds.dtype == jnp.float32
    assert bool(jnp.all(jnp.isfinite(preds)))
    print("KERNEL_OK")
</pallas_src>

<mosaic_0001>
module attributes {stable_mosaic.version = 11 : i64} {
  func.func @fused_bert_kernel(%arg0: i32, %arg1: i32, %arg2: memref<16x80xf32, #tpu.memory_space<vmem>>, %arg3: memref<16x16xf32, #tpu.memory_space<vmem>>, %arg4: memref<80x48xf32, #tpu.memory_space<vmem>>, %arg5: memref<1x48xf32, #tpu.memory_space<vmem>>, %arg6: memref<16x48xf32, #tpu.memory_space<vmem>>, %arg7: memref<1x48xf32, #tpu.memory_space<vmem>>, %arg8: memref<1x48xf32, #tpu.memory_space<vmem>>, %arg9: memref<1x48xf32, #tpu.memory_space<vmem>>, %arg10: memref<1x4x48x12xf32, #tpu.memory_space<vmem>>, %arg11: memref<1x4x1x12xf32, #tpu.memory_space<vmem>>, %arg12: memref<1x4x48x12xf32, #tpu.memory_space<vmem>>, %arg13: memref<1x4x1x12xf32, #tpu.memory_space<vmem>>, %arg14: memref<1x4x48x12xf32, #tpu.memory_space<vmem>>, %arg15: memref<1x4x1x12xf32, #tpu.memory_space<vmem>>, %arg16: memref<1x4x12x48xf32, #tpu.memory_space<vmem>>, %arg17: memref<1x1x48xf32, #tpu.memory_space<vmem>>, %arg18: memref<1x1x48xf32, #tpu.memory_space<vmem>>, %arg19: memref<1x1x48xf32, #tpu.memory_space<vmem>>, %arg20: memref<1x48x512xbf16, #tpu.memory_space<vmem>>, %arg21: memref<1x1x512xf32, #tpu.memory_space<vmem>>, %arg22: memref<1x512x48xbf16, #tpu.memory_space<vmem>>, %arg23: memref<1x1x48xf32, #tpu.memory_space<vmem>>, %arg24: memref<1x1x48xf32, #tpu.memory_space<vmem>>, %arg25: memref<1x1x48xf32, #tpu.memory_space<vmem>>, %arg26: memref<1x48xf32, #tpu.memory_space<vmem>>, %arg27: memref<1x1xf32, #tpu.memory_space<vmem>>, %arg28: memref<16x1xf32, #tpu.memory_space<vmem>>, %arg29: memref<16x48xf32, #tpu.memory_space<vmem>>, %arg30: memref<16x48xf32, #tpu.memory_space<vmem>>, %arg31: memref<16x48xf32, #tpu.memory_space<vmem>>) attributes {dimension_semantics = [#tpu.dimension_semantics<arbitrary>, #tpu.dimension_semantics<arbitrary>], iteration_bounds = array<i64: 2, 6>, scalar_prefetch = 0 : i64, scratch_operands = 3 : i64, tpu.core_type = #tpu.core_type<tc>, window_params = [{pipeline_mode = #tpu.pipeline_mode<synchronous>, transform_indices = @transform_0, window_bounds = array<i64: 16, 80>}, {pipeline_mode = #tpu.pipeline_mode<synchronous>, transform_indices = @transform_1, window_bounds = array<i64: 16, 16>}, {pipeline_mode = #tpu.pipeline_mode<synchronous>, transform_indices = @transform_2, window_bounds = array<i64: 80, 48>}, {pipeline_mode = #tpu.pipeline_mode<synchronous>, transform_indices = @transform_3, window_bounds = array<i64: 1, 48>}, {pipeline_mode = #tpu.pipeline_mode<synchronous>, transform_indices = @transform_4, window_bounds = array<i64: 16, 48>}, {pipeline_mode = #tpu.pipeline_mode<synchronous>, transform_indices = @transform_5, window_bounds = array<i64: 1, 48>}, {pipeline_mode = #tpu.pipeline_mode<synchronous>, transform_indices = @transform_6, window_bounds = array<i64: 1, 48>}, {pipeline_mode = #tpu.pipeline_mode<synchronous>, transform_indices = @transform_7, window_bounds = array<i64: 1, 48>}, {transform_indices = @transform_8, window_bounds = array<i64: 1, 4, 48, 12>}, {transform_indices = @transform_9, window_bounds = array<i64: 1, 4, 1, 12>}, {transform_indices = @transform_10, window_bounds = array<i64: 1, 4, 48, 12>}, {transform_indices = @transform_11, window_bounds = array<i64: 1, 4, 1, 12>}, {transform_indices = @transform_12, window_bounds = array<i64: 1, 4, 48, 12>}, {transform_indices = @transform_13, window_bounds = array<i64: 1, 4, 1, 12>}, {transform_indices = @transform_14, window_bounds = array<i64: 1, 4, 12, 48>}, {transform_indices = @transform_15, window_bounds = array<i64: 1, 1, 48>}, {transform_indices = @transform_16, window_bounds = array<i64: 1, 1, 48>}, {transform_indices = @transform_17, window_bounds = array<i64: 1, 1, 48>}, {transform_indices = @transform_18, window_bounds = array<i64: 1, 48, 512>}, {transform_indices = @transform_19, window_bounds = array<i64: 1, 1, 512>}, {transform_indices = @transform_20, window_bounds = array<i64: 1, 512, 48>}, {transform_indices = @transform_21, window_bounds = array<i64: 1, 1, 48>}, {transform_indices = @transform_22, window_bounds = array<i64: 1, 1, 48>}, {transform_indices = @transform_23, window_bounds = array<i64: 1, 1, 48>}, {pipeline_mode = #tpu.pipeline_mode<synchronous>, transform_indices = @transform_24, window_bounds = array<i64: 1, 48>}, {pipeline_mode = #tpu.pipeline_mode<synchronous>, transform_indices = @transform_25, window_bounds = array<i64: 1, 1>}, {pipeline_mode = #tpu.pipeline_mode<synchronous>, transform_indices = @transform_26, window_bounds = array<i64: 16, 1>}]} {
    %c5_i32 = arith.constant 5 : i32
    %0 = arith.cmpi eq, %arg1, %c5_i32 : i32
    %c1_i32 = arith.constant 1 : i32
    %1 = arith.cmpi eq, %arg0, %c1_i32 : i32
    %c0_i32 = arith.constant 0 : i32
    %2 = arith.cmpi eq, %arg0, %c0_i32 : i32
    %c0_i32_0 = arith.constant 0 : i32
    %3 = arith.cmpi eq, %arg1, %c0_i32_0 : i32
    %4 = arith.andi %2, %3 : i1
    %5 = arith.extui %4 : i1 to i32
    %c0_i32_1 = arith.constant 0 : i32
    %6 = arith.cmpi ne, %5, %c0_i32_1 : i32
    scf.if %6 {
      %c0_25 = arith.constant 0 : index
      %c0_26 = arith.constant 0 : index
      %44 = vector.load %arg2[%c0_25, %c0_26] : memref<16x80xf32, #tpu.memory_space<vmem>>, vector<16x80xf32>
      %c0_27 = arith.constant 0 : index
      %c0_28 = arith.constant 0 : index
      %45 = vector.load %arg4[%c0_27, %c0_28] : memref<80x48xf32, #tpu.memory_space<vmem>>, vector<80x48xf32>
      %cst_29 = arith.constant dense<0.000000e+00> : vector<16x48xf32>
      %46 = tpu.matmul %44, %45, %cst_29 {dimension_numbers = #tpu.dot_dimension_numbers<[1], [0], [0], [1], [0, 0, 1, 1], [], []>} : vector<16x80xf32>, vector<80x48xf32>, vector<16x48xf32> -> vector<16x48xf32>
      %c0_30 = arith.constant 0 : index
      %c0_31 = arith.constant 0 : index
      %47 = vector.load %arg5[%c0_30, %c0_31] : memref<1x48xf32, #tpu.memory_space<vmem>>, vector<1x48xf32>
      %48 = vector.broadcast %47 : vector<1x48xf32> to vector<16x48xf32>
      %49 = arith.addf %46, %48 : vector<16x48xf32>
      %c0_32 = arith.constant 0 : index
      %c0_33 = arith.constant 0 : index
      %50 = vector.load %arg6[%c0_32, %c0_33] : memref<16x48xf32, #tpu.memory_space<vmem>>, vector<16x48xf32>
      %51 = arith.addf %49, %50 : vector<16x48xf32>
      %c0_34 = arith.constant 0 : index
      %c0_35 = arith.constant 0 : index
      %52 = vector.load %arg7[%c0_34, %c0_35] : memref<1x48xf32, #tpu.memory_space<vmem>>, vector<1x48xf32>
      %53 = vector.broadcast %52 : vector<1x48xf32> to vector<16x48xf32>
      %54 = arith.addf %51, %53 : vector<16x48xf32>
      %c0_36 = arith.constant 0 : index
      %c0_37 = arith.constant 0 : index
      %55 = vector.load %arg8[%c0_36, %c0_37] : memref<1x48xf32, #tpu.memory_space<vmem>>, vector<1x48xf32>
      %c0_38 = arith.constant 0 : index
      %c0_39 = arith.constant 0 : index
      %56 = vector.load %arg9[%c0_38, %c0_39] : memref<1x48xf32, #tpu.memory_space<vmem>>, vector<1x48xf32>
      %cst_40 = arith.constant dense<0.000000e+00> : vector<16xf32>
      %57 = vector.multi_reduction <add>, %54, %cst_40 [1] : vector<16x48xf32> to vector<16xf32>
      %58 = vector.shape_cast %57 : vector<16xf32> to vector<16x1xf32>
      %cst_41 = arith.constant 4.800000e+01 : f32
      %59 = vector.broadcast %cst_41 : f32 to vector<16x1xf32>
      %60 = arith.divf %58, %59 : vector<16x1xf32>
      %61 = vector.broadcast %60 : vector<16x1xf32> to vector<16x48xf32>
      %62 = arith.subf %54, %61 : vector<16x48xf32>
      %63 = arith.mulf %62, %62 : vector<16x48xf32>
      %cst_42 = arith.constant dense<0.000000e+00> : vector<16xf32>
      %64 = vector.multi_reduction <add>, %63, %cst_42 [1] : vector<16x48xf32> to vector<16xf32>
      %65 = vector.shape_cast %64 : vector<16xf32> to vector<16x1xf32>
      %cst_43 = arith.constant 4.800000e+01 : f32
      %66 = vector.broadcast %cst_43 : f32 to vector<16x1xf32>
      %67 = arith.divf %65, %66 : vector<16x1xf32>
      %68 = vector.broadcast %60 : vector<16x1xf32> to vector<16x48xf32>
      %69 = arith.subf %54, %68 : vector<16x48xf32>
      %cst_44 = arith.constant 9.99999996E-13 : f32
      %70 = vector.broadcast %cst_44 : f32 to vector<16x1xf32>
      %71 = arith.addf %67, %70 : vector<16x1xf32>
      %72 = math.rsqrt %71 : vector<16x1xf32>
      %73 = vector.broadcast %72 : vector<16x1xf32> to vector<16x48xf32>
      %74 = arith.mulf %69, %73 : vector<16x48xf32>
      %75 = vector.broadcast %55 : vector<1x48xf32> to vector<16x48xf32>
      %76 = arith.mulf %74, %75 : vector<16x48xf32>
      %77 = vector.broadcast %56 : vector<1x48xf32> to vector<16x48xf32>
      %78 = arith.addf %76, %77 : vector<16x48xf32>
      %c0_45 = arith.constant 0 : index
      %c0_46 = arith.constant 0 : index
      %79 = vector.load %arg29[%c0_45, %c0_46] : memref<16x48xf32, #tpu.memory_space<vmem>>, vector<16x48xf32>
      tpu.vector_store %arg29[%c0_45, %c0_46], %78 {strides = array<i32>} : memref<16x48xf32, #tpu.memory_space<vmem>>, vector<16x48xf32>,
    } else {
    }
    %c0_i32_2 = arith.constant 0 : i32
    %7 = arith.cmpi eq, %arg1, %c0_i32_2 : i32
    %8 = arith.extui %7 : i1 to i32
    %c0_i32_3 = arith.constant 0 : i32
    %9 = arith.cmpi ne, %8, %c0_i32_3 : i32
    scf.if %9 {
      %c0_25 = arith.constant 0 : index
      %c0_26 = arith.constant 0 : index
      %44 = vector.load %arg29[%c0_25, %c0_26] : memref<16x48xf32, #tpu.memory_space<vmem>>, vector<16x48xf32>
      %c0_27 = arith.constant 0 : index
      %c0_28 = arith.constant 0 : index
      %45 = vector.load %arg3[%c0_27, %c0_28] : memref<16x16xf32, #tpu.memory_space<vmem>>, vector<16x16xf32>
      %c0_29 = arith.constant 0 : index
      %c0_30 = arith.constant 0 : index
      %c0_31 = arith.constant 0 : index
      %c0_32 = arith.constant 0 : index
      %46 = vector.load %arg10[%c0_29, %c0_30, %c0_31, %c0_32] : memref<1x4x48x12xf32, #tpu.memory_space<vmem>>, vector<1x1x48x12xf32>
      %47 = vector.shape_cast %46 : vector<1x1x48x12xf32> to vector<48x12xf32>
      %cst_33 = arith.constant dense<0.000000e+00> : vector<16x12xf32>
      %48 = tpu.matmul %44, %47, %cst_33 {dimension_numbers = #tpu.dot_dimension_numbers<[1], [0], [0], [1], [0, 0, 1, 1], [], []>} : vector<16x48xf32>, vector<48x12xf32>, vector<16x12xf32> -> vector<16x12xf32>
      %c0_34 = arith.constant 0 : index
      %c0_35 = arith.constant 0 : index
      %c0_36 = arith.constant 0 : index
      %c0_37 = arith.constant 0 : index
      %49 = vector.load %arg11[%c0_34, %c0_35, %c0_36, %c0_37] : memref<1x4x1x12xf32, #tpu.memory_space<vmem>>, vector<1x1x1x12xf32>
      %50 = vector.shape_cast %49 : vector<1x1x1x12xf32> to vector<1x12xf32>
      %51 = vector.broadcast %50 : vector<1x12xf32> to vector<16x12xf32>
      %52 = arith.addf %48, %51 : vector<16x12xf32>
      %c0_38 = arith.constant 0 : index
      %c0_39 = arith.constant 0 : index
      %c0_40 = arith.constant 0 : index
      %c0_41 = arith.constant 0 : index
      %53 = vector.load %arg12[%c0_38, %c0_39, %c0_40, %c0_41] : memref<1x4x48x12xf32, #tpu.memory_space<vmem>>, vector<1x1x48x12xf32>
      %54 = vector.shape_cast %53 : vector<1x1x48x12xf32> to vector<48x12xf32>
      %cst_42 = arith.constant dense<0.000000e+00> : vector<16x12xf32>
      %55 = tpu.matmul %44, %54, %cst_42 {dimension_numbers = #tpu.dot_dimension_numbers<[1], [0], [0], [1], [0, 0, 1, 1], [], []>} : vector<16x48xf32>, vector<48x12xf32>, vector<16x12xf32> -> vector<16x12xf32>
      %c0_43 = arith.constant 0 : index
      %c0_44 = arith.constant 0 : index
      %c0_45 = arith.constant 0 : index
      %c0_46 = arith.constant 0 : index
      %56 = vector.load %arg13[%c0_43, %c0_44, %c0_45, %c0_46] : memref<1x4x1x12xf32, #tpu.memory_space<vmem>>, vector<1x1x1x12xf32>
      %57 = vector.shape_cast %56 : vector<1x1x1x12xf32> to vector<1x12xf32>
      %58 = vector.broadcast %57 : vector<1x12xf32> to vector<16x12xf32>
      %59 = arith.addf %55, %58 : vector<16x12xf32>
      %c0_47 = arith.constant 0 : index
      %c0_48 = arith.constant 0 : index
      %c0_49 = arith.constant 0 : index
      %c0_50 = arith.constant 0 : index
      %60 = vector.load %arg14[%c0_47, %c0_48, %c0_49, %c0_50] : memref<1x4x48x12xf32, #tpu.memory_space<vmem>>, vector<1x1x48x12xf32>
      %61 = vector.shape_cast %60 : vector<1x1x48x12xf32> to vector<48x12xf32>
      %cst_51 = arith.constant dense<0.000000e+00> : vector<16x12xf32>
      %62 = tpu.matmul %44, %61, %cst_51 {dimension_numbers = #tpu.dot_dimension_numbers<[1], [0], [0], [1], [0, 0, 1, 1], [], []>} : vector<16x48xf32>, vector<48x12xf32>, vector<16x12xf32> -> vector<16x12xf32>
      %c0_52 = arith.constant 0 : index
      %c0_53 = arith.constant 0 : index
      %c0_54 = arith.constant 0 : index
      %c0_55 = arith.constant 0 : index
      %63 = vector.load %arg15[%c0_52, %c0_53, %c0_54, %c0_55] : memref<1x4x1x12xf32, #tpu.memory_space<vmem>>, vector<1x1x1x12xf32>
      %64 = vector.shape_cast %63 : vector<1x1x1x12xf32> to vector<1x12xf32>
      %65 = vector.broadcast %64 : vector<1x12xf32> to vector<16x12xf32>
      %66 = arith.addf %62, %65 : vector<16x12xf32>
      %cst_56 = arith.constant dense<0.000000e+00> : vector<16x16xf32>
      %67 = tpu.matmul %52, %59, %cst_56 {dimension_numbers = #tpu.dot_dimension_numbers<[1], [1], [0], [0], [0, 0, 1, 0], [], []>} : vector<16x12xf32>, vector<16x12xf32>, vector<16x16xf32> -> vector<16x16xf32>
      %68 = arith.addf %67, %45 : vector<16x16xf32>
      %cst_57 = arith.constant dense<0xFF800000> : vector<16xf32>
      %69 = vector.multi_reduction <maximumf>, %68, %cst_57 [1] : vector<16x16xf32> to vector<16xf32>
      %70 = vector.shape_cast %69 : vector<16xf32> to vector<16x1xf32>
      %71 = vector.broadcast %70 : vector<16x1xf32> to vector<16x16xf32>
      %72 = arith.subf %68, %71 : vector<16x16xf32>
      %73 = math.exp %72 : vector<16x16xf32>
      %cst_58 = arith.constant dense<0.000000e+00> : vector<16xf32>
      %74 = vector.multi_reduction <add>, %73, %cst_58 [1] : vector<16x16xf32> to vector<16xf32>
      %75 = vector.shape_cast %74 : vector<16xf32> to vector<16x1xf32>
      %76 = vector.broadcast %75 : vector<16x1xf32> to vector<16x16xf32>
      %77 = arith.divf %73, %76 : vector<16x16xf32>
      %cst_59 = arith.constant dense<0.000000e+00> : vector<16x12xf32>
      %78 = tpu.matmul %77, %66, %cst_59 {dimension_numbers = #tpu.dot_dimension_numbers<[1], [0], [0], [1], [0, 0, 1, 1], [], []>} : vector<16x16xf32>, vector<16x12xf32>, vector<16x12xf32> -> vector<16x12xf32>
      %c0_60 = arith.constant 0 : index
      %c0_61 = arith.constant 0 : index
      %c0_62 = arith.constant 0 : index
      %c0_63 = arith.constant 0 : index
      %79 = vector.load %arg16[%c0_60, %c0_61, %c0_62, %c0_63] : memref<1x4x12x48xf32, #tpu.memory_space<vmem>>, vector<1x1x12x48xf32>
      %80 = vector.shape_cast %79 : vector<1x1x12x48xf32> to vector<12x48xf32>
      %cst_64 = arith.constant dense<0.000000e+00> : vector<16x48xf32>
      %81 = tpu.matmul %78, %80, %cst_64 {dimension_numbers = #tpu.dot_dimension_numbers<[1], [0], [0], [1], [0, 0, 1, 1], [], []>} : vector<16x12xf32>, vector<12x48xf32>, vector<16x48xf32> -> vector<16x48xf32>
      %c0_65 = arith.constant 0 : index
      %c1 = arith.constant 1 : index
      %c0_66 = arith.constant 0 : index
      %c0_67 = arith.constant 0 : index
      %82 = vector.load %arg10[%c0_65, %c1, %c0_66, %c0_67] : memref<1x4x48x12xf32, #tpu.memory_space<vmem>>, vector<1x1x48x12xf32>
      %83 = vector.shape_cast %82 : vector<1x1x48x12xf32> to vector<48x12xf32>
      %cst_68 = arith.constant dense<0.000000e+00> : vector<16x12xf32>
      %84 = tpu.matmul %44, %83, %cst_68 {dimension_numbers = #tpu.dot_dimension_numbers<[1], [0], [0], [1], [0, 0, 1, 1], [], []>} : vector<16x48xf32>, vector<48x12xf32>, vector<16x12xf32> -> vector<16x12xf32>
      %c0_69 = arith.constant 0 : index
      %c1_70 = arith.constant 1 : index
      %c0_71 = arith.constant 0 : index
      %c0_72 = arith.constant 0 : index
      %85 = vector.load %arg11[%c0_69, %c1_70, %c0_71, %c0_72] : memref<1x4x1x12xf32, #tpu.memory_space<vmem>>, vector<1x1x1x12xf32>
      %86 = vector.shape_cast %85 : vector<1x1x1x12xf32> to vector<1x12xf32>
      %87 = vector.broadcast %86 : vector<1x12xf32> to vector<16x12xf32>
      %88 = arith.addf %84, %87 : vector<16x12xf32>
      %c0_73 = arith.constant 0 : index
      %c1_74 = arith.constant 1 : index
      %c0_75 = arith.constant 0 : index
      %c0_76 = arith.constant 0 : index
      %89 = vector.load %arg12[%c0_73, %c1_74, %c0_75, %c0_76] : memref<1x4x48x12xf32, #tpu.memory_space<vmem>>, vector<1x1x48x12xf32>
      %90 = vector.shape_cast %89 : vector<1x1x48x12xf32> to vector<48x12xf32>
      %cst_77 = arith.constant dense<0.000000e+00> : vector<16x12xf32>
      %91 = tpu.matmul %44, %90, %cst_77 {dimension_numbers = #tpu.dot_dimension_numbers<[1], [0], [0], [1], [0, 0, 1, 1], [], []>} : vector<16x48xf32>, vector<48x12xf32>, vector<16x12xf32> -> vector<16x12xf32>
      %c0_78 = arith.constant 0 : index
      %c1_79 = arith.constant 1 : index
      %c0_80 = arith.constant 0 : index
      %c0_81 = arith.constant 0 : index
      %92 = vector.load %arg13[%c0_78, %c1_79, %c0_80, %c0_81] : memref<1x4x1x12xf32, #tpu.memory_space<vmem>>, vector<1x1x1x12xf32>
      %93 = vector.shape_cast %92 : vector<1x1x1x12xf32> to vector<1x12xf32>
      %94 = vector.broadcast %93 : vector<1x12xf32> to vector<16x12xf32>
      %95 = arith.addf %91, %94 : vector<16x12xf32>
      %c0_82 = arith.constant 0 : index
      %c1_83 = arith.constant 1 : index
      %c0_84 = arith.constant 0 : index
      %c0_85 = arith.constant 0 : index
      %96 = vector.load %arg14[%c0_82, %c1_83, %c0_84, %c0_85] : memref<1x4x48x12xf32, #tpu.memory_space<vmem>>, vector<1x1x48x12xf32>
      %97 = vector.shape_cast %96 : vector<1x1x48x12xf32> to vector<48x12xf32>
      %cst_86 = arith.constant dense<0.000000e+00> : vector<16x12xf32>
      %98 = tpu.matmul %44, %97, %cst_86 {dimension_numbers = #tpu.dot_dimension_numbers<[1], [0], [0], [1], [0, 0, 1, 1], [], []>} : vector<16x48xf32>, vector<48x12xf32>, vector<16x12xf32> -> vector<16x12xf32>
      %c0_87 = arith.constant 0 : index
      %c1_88 = arith.constant 1 : index
      %c0_89 = arith.constant 0 : index
      %c0_90 = arith.constant 0 : index
      %99 = vector.load %arg15[%c0_87, %c1_88, %c0_89, %c0_90] : memref<1x4x1x12xf32, #tpu.memory_space<vmem>>, vector<1x1x1x12xf32>
      %100 = vector.shape_cast %99 : vector<1x1x1x12xf32> to vector<1x12xf32>
      %101 = vector.broadcast %100 : vector<1x12xf32> to vector<16x12xf32>
      %102 = arith.addf %98, %101 : vector<16x12xf32>
      %cst_91 = arith.constant dense<0.000000e+00> : vector<16x16xf32>
      %103 = tpu.matmul %88, %95, %cst_91 {dimension_numbers = #tpu.dot_dimension_numbers<[1], [1], [0], [0], [0, 0, 1, 0], [], []>} : vector<16x12xf32>, vector<16x12xf32>, vector<16x16xf32> -> vector<16x16xf32>
      %104 = arith.addf %103, %45 : vector<16x16xf32>
      %cst_92 = arith.constant dense<0xFF800000> : vector<16xf32>
      %105 = vector.multi_reduction <maximumf>, %104, %cst_92 [1] : vector<16x16xf32> to vector<16xf32>
      %106 = vector.shape_cast %105 : vector<16xf32> to vector<16x1xf32>
      %107 = vector.broadcast %106 : vector<16x1xf32> to vector<16x16xf32>
      %108 = arith.subf %104, %107 : vector<16x16xf32>
      %109 = math.exp %108 : vector<16x16xf32>
      %cst_93 = arith.constant dense<0.000000e+00> : vector<16xf32>
      %110 = vector.multi_reduction <add>, %109, %cst_93 [1] : vector<16x16xf32> to vector<16xf32>
      %111 = vector.shape_cast %110 : vector<16xf32> to vector<16x1xf32>
      %112 = vector.broadcast %111 : vector<16x1xf32> to vector<16x16xf32>
      %113 = arith.divf %109, %112 : vector<16x16xf32>
      %cst_94 = arith.constant dense<0.000000e+00> : vector<16x12xf32>
      %114 = tpu.matmul %113, %102, %cst_94 {dimension_numbers = #tpu.dot_dimension_numbers<[1], [0], [0], [1], [0, 0, 1, 1], [], []>} : vector<16x16xf32>, vector<16x12xf32>, vector<16x12xf32> -> vector<16x12xf32>
      %c0_95 = arith.constant 0 : index
      %c1_96 = arith.constant 1 : index
      %c0_97 = arith.constant 0 : index
      %c0_98 = arith.constant 0 : index
      %115 = vector.load %arg16[%c0_95, %c1_96, %c0_97, %c0_98] : memref<1x4x12x48xf32, #tpu.memory_space<vmem>>, vector<1x1x12x48xf32>
      %116 = vector.shape_cast %115 : vector<1x1x12x48xf32> to vector<12x48xf32>
      %cst_99 = arith.constant dense<0.000000e+00> : vector<16x48xf32>
      %117 = tpu.matmul %114, %116, %cst_99 {dimension_numbers = #tpu.dot_dimension_numbers<[1], [0], [0], [1], [0, 0, 1, 1], [], []>} : vector<16x12xf32>, vector<12x48xf32>, vector<16x48xf32> -> vector<16x48xf32>
      %118 = arith.addf %81, %117 : vector<16x48xf32>
      %c0_100 = arith.constant 0 : index
      %c2 = arith.constant 2 : index
      %c0_101 = arith.constant 0 : index
      %c0_102 = arith.constant 0 : index
      %119 = vector.load %arg10[%c0_100, %c2, %c0_101, %c0_102] : memref<1x4x48x12xf32, #tpu.memory_space<vmem>>, vector<1x1x48x12xf32>
      %120 = vector.shape_cast %119 : vector<1x1x48x12xf32> to vector<48x12xf32>
      %cst_103 = arith.constant dense<0.000000e+00> : vector<16x12xf32>
      %121 = tpu.matmul %44, %120, %cst_103 {dimension_numbers = #tpu.dot_dimension_numbers<[1], [0], [0], [1], [0, 0, 1, 1], [], []>} : vector<16x48xf32>, vector<48x12xf32>, vector<16x12xf32> -> vector<16x12xf32>
      %c0_104 = arith.constant 0 : index
      %c2_105 = arith.constant 2 : index
      %c0_106 = arith.constant 0 : index
      %c0_107 = arith.constant 0 : index
      %122 = vector.load %arg11[%c0_104, %c2_105, %c0_106, %c0_107] : memref<1x4x1x12xf32, #tpu.memory_space<vmem>>, vector<1x1x1x12xf32>
      %123 = vector.shape_cast %122 : vector<1x1x1x12xf32> to vector<1x12xf32>
      %124 = vector.broadcast %123 : vector<1x12xf32> to vector<16x12xf32>
      %125 = arith.addf %121, %124 : vector<16x12xf32>
      %c0_108 = arith.constant 0 : index
      %c2_109 = arith.constant 2 : index
      %c0_110 = arith.constant 0 : index
      %c0_111 = arith.constant 0 : index
      %126 = vector.load %arg12[%c0_108, %c2_109, %c0_110, %c0_111] : memref<1x4x48x12xf32, #tpu.memory_space<vmem>>, vector<1x1x48x12xf32>
      %127 = vector.shape_cast %126 : vector<1x1x48x12xf32> to vector<48x12xf32>
      %cst_112 = arith.constant dense<0.000000e+00> : vector<16x12xf32>
      %128 = tpu.matmul %44, %127, %cst_112 {dimension_numbers = #tpu.dot_dimension_numbers<[1], [0], [0], [1], [0, 0, 1, 1], [], []>} : vector<16x48xf32>, vector<48x12xf32>, vector<16x12xf32> -> vector<16x12xf32>
      %c0_113 = arith.constant 0 : index
      %c2_114 = arith.constant 2 : index
      %c0_115 = arith.constant 0 : index
      %c0_116 = arith.constant 0 : index
      %129 = vector.load %arg13[%c0_113, %c2_114, %c0_115, %c0_116] : memref<1x4x1x12xf32, #tpu.memory_space<vmem>>, vector<1x1x1x12xf32>
      %130 = vector.shape_cast %129 : vector<1x1x1x12xf32> to vector<1x12xf32>
      %131 = vector.broadcast %130 : vector<1x12xf32> to vector<16x12xf32>
      %132 = arith.addf %128, %131 : vector<16x12xf32>
      %c0_117 = arith.constant 0 : index
      %c2_118 = arith.constant 2 : index
      %c0_119 = arith.constant 0 : index
      %c0_120 = arith.constant 0 : index
      %133 = vector.load %arg14[%c0_117, %c2_118, %c0_119, %c0_120] : memref<1x4x48x12xf32, #tpu.memory_space<vmem>>, vector<1x1x48x12xf32>
      %134 = vector.shape_cast %133 : vector<1x1x48x12xf32> to vector<48x12xf32>
      %cst_121 = arith.constant dense<0.000000e+00> : vector<16x12xf32>
      %135 = tpu.matmul %44, %134, %cst_121 {dimension_numbers = #tpu.dot_dimension_numbers<[1], [0], [0], [1], [0, 0, 1, 1], [], []>} : vector<16x48xf32>, vector<48x12xf32>, vector<16x12xf32> -> vector<16x12xf32>
      %c0_122 = arith.constant 0 : index
      %c2_123 = arith.constant 2 : index
      %c0_124 = arith.constant 0 : index
      %c0_125 = arith.constant 0 : index
      %136 = vector.load %arg15[%c0_122, %c2_123, %c0_124, %c0_125] : memref<1x4x1x12xf32, #tpu.memory_space<vmem>>, vector<1x1x1x12xf32>
      %137 = vector.shape_cast %136 : vector<1x1x1x12xf32> to vector<1x12xf32>
      %138 = vector.broadcast %137 : vector<1x12xf32> to vector<16x12xf32>
      %139 = arith.addf %135, %138 : vector<16x12xf32>
      %cst_126 = arith.constant dense<0.000000e+00> : vector<16x16xf32>
      %140 = tpu.matmul %125, %132, %cst_126 {dimension_numbers = #tpu.dot_dimension_numbers<[1], [1], [0], [0], [0, 0, 1, 0], [], []>} : vector<16x12xf32>, vector<16x12xf32>, vector<16x16xf32> -> vector<16x16xf32>
      %141 = arith.addf %140, %45 : vector<16x16xf32>
      %cst_127 = arith.constant dense<0xFF800000> : vector<16xf32>
      %142 = vector.multi_reduction <maximumf>, %141, %cst_127 [1] : vector<16x16xf32> to vector<16xf32>
      %143 = vector.shape_cast %142 : vector<16xf32> to vector<16x1xf32>
      %144 = vector.broadcast %143 : vector<16x1xf32> to vector<16x16xf32>
      %145 = arith.subf %141, %144 : vector<16x16xf32>
      %146 = math.exp %145 : vector<16x16xf32>
      %cst_128 = arith.constant dense<0.000000e+00> : vector<16xf32>
      %147 = vector.multi_reduction <add>, %146, %cst_128 [1] : vector<16x16xf32> to vector<16xf32>
      %148 = vector.shape_cast %147 : vector<16xf32> to vector<16x1xf32>
      %149 = vector.broadcast %148 : vector<16x1xf32> to vector<16x16xf32>
      %150 = arith.divf %146, %149 : vector<16x16xf32>
      %cst_129 = arith.constant dense<0.000000e+00> : vector<16x12xf32>
      %151 = tpu.matmul %150, %139, %cst_129 {dimension_numbers = #tpu.dot_dimension_numbers<[1], [0], [0], [1], [0, 0, 1, 1], [], []>} : vector<16x16xf32>, vector<16x12xf32>, vector<16x12xf32> -> vector<16x12xf32>
      %c0_130 = arith.constant 0 : index
      %c2_131 = arith.constant 2 : index
      %c0_132 = arith.constant 0 : index
      %c0_133 = arith.constant 0 : index
      %152 = vector.load %arg16[%c0_130, %c2_131, %c0_132, %c0_133] : memref<1x4x12x48xf32, #tpu.memory_space<vmem>>, vector<1x1x12x48xf32>
      %153 = vector.shape_cast %152 : vector<1x1x12x48xf32> to vector<12x48xf32>
      %cst_134 = arith.constant dense<0.000000e+00> : vector<16x48xf32>
      %154 = tpu.matmul %151, %153, %cst_134 {dimension_numbers = #tpu.dot_dimension_numbers<[1], [0], [0], [1], [0, 0, 1, 1], [], []>} : vector<16x12xf32>, vector<12x48xf32>, vector<16x48xf32> -> vector<16x48xf32>
      %155 = arith.addf %118, %154 : vector<16x48xf32>
      %c0_135 = arith.constant 0 : index
      %c3 = arith.constant 3 : index
      %c0_136 = arith.constant 0 : index
      %c0_137 = arith.constant 0 : index
      %156 = vector.load %arg10[%c0_135, %c3, %c0_136, %c0_137] : memref<1x4x48x12xf32, #tpu.memory_space<vmem>>, vector<1x1x48x12xf32>
      %157 = vector.shape_cast %156 : vector<1x1x48x12xf32> to vector<48x12xf32>
      %cst_138 = arith.constant dense<0.000000e+00> : vector<16x12xf32>
      %158 = tpu.matmul %44, %157, %cst_138 {dimension_numbers = #tpu.dot_dimension_numbers<[1], [0], [0], [1], [0, 0, 1, 1], [], []>} : vector<16x48xf32>, vector<48x12xf32>, vector<16x12xf32> -> vector<16x12xf32>
      %c0_139 = arith.constant 0 : index
      %c3_140 = arith.constant 3 : index
      %c0_141 = arith.constant 0 : index
      %c0_142 = arith.constant 0 : index
      %159 = vector.load %arg11[%c0_139, %c3_140, %c0_141, %c0_142] : memref<1x4x1x12xf32, #tpu.memory_space<vmem>>, vector<1x1x1x12xf32>
      %160 = vector.shape_cast %159 : vector<1x1x1x12xf32> to vector<1x12xf32>
      %161 = vector.broadcast %160 : vector<1x12xf32> to vector<16x12xf32>
      %162 = arith.addf %158, %161 : vector<16x12xf32>
      %c0_143 = arith.constant 0 : index
      %c3_144 = arith.constant 3 : index
      %c0_145 = arith.constant 0 : index
      %c0_146 = arith.constant 0 : index
      %163 = vector.load %arg12[%c0_143, %c3_144, %c0_145, %c0_146] : memref<1x4x48x12xf32, #tpu.memory_space<vmem>>, vector<1x1x48x12xf32>
      %164 = vector.shape_cast %163 : vector<1x1x48x12xf32> to vector<48x12xf32>
      %cst_147 = arith.constant dense<0.000000e+00> : vector<16x12xf32>
      %165 = tpu.matmul %44, %164, %cst_147 {dimension_numbers = #tpu.dot_dimension_numbers<[1], [0], [0], [1], [0, 0, 1, 1], [], []>} : vector<16x48xf32>, vector<48x12xf32>, vector<16x12xf32> -> vector<16x12xf32>
      %c0_148 = arith.constant 0 : index
      %c3_149 = arith.constant 3 : index
      %c0_150 = arith.constant 0 : index
      %c0_151 = arith.constant 0 : index
      %166 = vector.load %arg13[%c0_148, %c3_149, %c0_150, %c0_151] : memref<1x4x1x12xf32, #tpu.memory_space<vmem>>, vector<1x1x1x12xf32>
      %167 = vector.shape_cast %166 : vector<1x1x1x12xf32> to vector<1x12xf32>
      %168 = vector.broadcast %167 : vector<1x12xf32> to vector<16x12xf32>
      %169 = arith.addf %165, %168 : vector<16x12xf32>
      %c0_152 = arith.constant 0 : index
      %c3_153 = arith.constant 3 : index
      %c0_154 = arith.constant 0 : index
      %c0_155 = arith.constant 0 : index
      %170 = vector.load %arg14[%c0_152, %c3_153, %c0_154, %c0_155] : memref<1x4x48x12xf32, #tpu.memory_space<vmem>>, vector<1x1x48x12xf32>
      %171 = vector.shape_cast %170 : vector<1x1x48x12xf32> to vector<48x12xf32>
      %cst_156 = arith.constant dense<0.000000e+00> : vector<16x12xf32>
      %172 = tpu.matmul %44, %171, %cst_156 {dimension_numbers = #tpu.dot_dimension_numbers<[1], [0], [0], [1], [0, 0, 1, 1], [], []>} : vector<16x48xf32>, vector<48x12xf32>, vector<16x12xf32> -> vector<16x12xf32>
      %c0_157 = arith.constant 0 : index
      %c3_158 = arith.constant 3 : index
      %c0_159 = arith.constant 0 : index
      %c0_160 = arith.constant 0 : index
      %173 = vector.load %arg15[%c0_157, %c3_158, %c0_159, %c0_160] : memref<1x4x1x12xf32, #tpu.memory_space<vmem>>, vector<1x1x1x12xf32>
      %174 = vector.shape_cast %173 : vector<1x1x1x12xf32> to vector<1x12xf32>
      %175 = vector.broadcast %174 : vector<1x12xf32> to vector<16x12xf32>
      %176 = arith.addf %172, %175 : vector<16x12xf32>
      %cst_161 = arith.constant dense<0.000000e+00> : vector<16x16xf32>
      %177 = tpu.matmul %162, %169, %cst_161 {dimension_numbers = #tpu.dot_dimension_numbers<[1], [1], [0], [0], [0, 0, 1, 0], [], []>} : vector<16x12xf32>, vector<16x12xf32>, vector<16x16xf32> -> vector<16x16xf32>
      %178 = arith.addf %177, %45 : vector<16x16xf32>
      %cst_162 = arith.constant dense<0xFF800000> : vector<16xf32>
      %179 = vector.multi_reduction <maximumf>, %178, %cst_162 [1] : vector<16x16xf32> to vector<16xf32>
      %180 = vector.shape_cast %179 : vector<16xf32> to vector<16x1xf32>
      %181 = vector.broadcast %180 : vector<16x1xf32> to vector<16x16xf32>
      %182 = arith.subf %178, %181 : vector<16x16xf32>
      %183 = math.exp %182 : vector<16x16xf32>
      %cst_163 = arith.constant dense<0.000000e+00> : vector<16xf32>
      %184 = vector.multi_reduction <add>, %183, %cst_163 [1] : vector<16x16xf32> to vector<16xf32>
      %185 = vector.shape_cast %184 : vector<16xf32> to vector<16x1xf32>
      %186 = vector.broadcast %185 : vector<16x1xf32> to vector<16x16xf32>
      %187 = arith.divf %183, %186 : vector<16x16xf32>
      %cst_164 = arith.constant dense<0.000000e+00> : vector<16x12xf32>
      %188 = tpu.matmul %187, %176, %cst_164 {dimension_numbers = #tpu.dot_dimension_numbers<[1], [0], [0], [1], [0, 0, 1, 1], [], []>} : vector<16x16xf32>, vector<16x12xf32>, vector<16x12xf32> -> vector<16x12xf32>
      %c0_165 = arith.constant 0 : index
      %c3_166 = arith.constant 3 : index
      %c0_167 = arith.constant 0 : index
      %c0_168 = arith.constant 0 : index
      %189 = vector.load %arg16[%c0_165, %c3_166, %c0_167, %c0_168] : memref<1x4x12x48xf32, #tpu.memory_space<vmem>>, vector<1x1x12x48xf32>
      %190 = vector.shape_cast %189 : vector<1x1x12x48xf32> to vector<12x48xf32>
      %cst_169 = arith.constant dense<0.000000e+00> : vector<16x48xf32>
      %191 = tpu.matmul %188, %190, %cst_169 {dimension_numbers = #tpu.dot_dimension_numbers<[1], [0], [0], [1], [0, 0, 1, 1], [], []>} : vector<16x12xf32>, vector<12x48xf32>, vector<16x48xf32> -> vector<16x48xf32>
      %192 = arith.addf %155, %191 : vector<16x48xf32>
      %c0_170 = arith.constant 0 : index
      %c0_171 = arith.constant 0 : index
      %c0_172 = arith.constant 0 : index
      %193 = vector.load %arg17[%c0_170, %c0_171, %c0_172] : memref<1x1x48xf32, #tpu.memory_space<vmem>>, vector<1x1x48xf32>
      %194 = vector.shape_cast %193 : vector<1x1x48xf32> to vector<1x48xf32>
      %195 = vector.broadcast %194 : vector<1x48xf32> to vector<16x48xf32>
      %196 = arith.addf %192, %195 : vector<16x48xf32>
      %197 = arith.addf %196, %44 : vector<16x48xf32>
      %c0_173 = arith.constant 0 : index
      %c0_174 = arith.constant 0 : index
      %c0_175 = arith.constant 0 : index
      %198 = vector.load %arg18[%c0_173, %c0_174, %c0_175] : memref<1x1x48xf32, #tpu.memory_space<vmem>>, vector<1x1x48xf32>
      %199 = vector.shape_cast %198 : vector<1x1x48xf32> to vector<1x48xf32>
      %c0_176 = arith.constant 0 : index
      %c0_177 = arith.constant 0 : index
      %c0_178 = arith.constant 0 : index
      %200 = vector.load %arg19[%c0_176, %c0_177, %c0_178] : memref<1x1x48xf32, #tpu.memory_space<vmem>>, vector<1x1x48xf32>
      %201 = vector.shape_cast %200 : vector<1x1x48xf32> to vector<1x48xf32>
      %cst_179 = arith.constant dense<0.000000e+00> : vector<16xf32>
      %202 = vector.multi_reduction <add>, %197, %cst_179 [1] : vector<16x48xf32> to vector<16xf32>
      %203 = vector.shape_cast %202 : vector<16xf32> to vector<16x1xf32>
      %cst_180 = arith.constant 4.800000e+01 : f32
      %204 = vector.broadcast %cst_180 : f32 to vector<16x1xf32>
      %205 = arith.divf %203, %204 : vector<16x1xf32>
      %206 = vector.broadcast %205 : vector<16x1xf32> to vector<16x48xf32>
      %207 = arith.subf %197, %206 : vector<16x48xf32>
      %208 = arith.mulf %207, %207 : vector<16x48xf32>
      %cst_181 = arith.constant dense<0.000000e+00> : vector<16xf32>
      %209 = vector.multi_reduction <add>, %208, %cst_181 [1] : vector<16x48xf32> to vector<16xf32>
      %210 = vector.shape_cast %209 : vector<16xf32> to vector<16x1xf32>
      %cst_182 = arith.constant 4.800000e+01 : f32
      %211 = vector.broadcast %cst_182 : f32 to vector<16x1xf32>
      %212 = arith.divf %210, %211 : vector<16x1xf32>
      %213 = vector.broadcast %205 : vector<16x1xf32> to vector<16x48xf32>
      %214 = arith.subf %197, %213 : vector<16x48xf32>
      %cst_183 = arith.constant 9.99999996E-13 : f32
      %215 = vector.broadcast %cst_183 : f32 to vector<16x1xf32>
      %216 = arith.addf %212, %215 : vector<16x1xf32>
      %217 = math.rsqrt %216 : vector<16x1xf32>
      %218 = vector.broadcast %217 : vector<16x1xf32> to vector<16x48xf32>
      %219 = arith.mulf %214, %218 : vector<16x48xf32>
      %220 = vector.broadcast %199 : vector<1x48xf32> to vector<16x48xf32>
      %221 = arith.mulf %219, %220 : vector<16x48xf32>
      %222 = vector.broadcast %201 : vector<1x48xf32> to vector<16x48xf32>
      %223 = arith.addf %221, %222 : vector<16x48xf32>
      %c0_184 = arith.constant 0 : index
      %c0_185 = arith.constant 0 : index
      %224 = vector.load %arg30[%c0_184, %c0_185] : memref<16x48xf32, #tpu.memory_space<vmem>>, vector<16x48xf32>
      tpu.vector_store %arg30[%c0_184, %c0_185], %223 {strides = array<i32>} : memref<16x48xf32, #tpu.memory_space<vmem>>, vector<16x48xf32>,
      %cst_186 = arith.constant 0.000000e+00 : f32
      %225 = vector.broadcast %cst_186 : f32 to vector<16x48xf32>
      %c0_187 = arith.constant 0 : index
      %c0_188 = arith.constant 0 : index
      %226 = vector.load %arg31[%c0_187, %c0_188] : memref<16x48xf32, #tpu.memory_space<vmem>>, vector<16x48xf32>
      tpu.vector_store %arg31[%c0_187, %c0_188], %225 {strides = array<i32>} : memref<16x48xf32, #tpu.memory_space<vmem>>, vector<16x48xf32>,
    } else {
    }
    %c0 = arith.constant 0 : index
    %c0_4 = arith.constant 0 : index
    %10 = vector.load %arg30[%c0, %c0_4] : memref<16x48xf32, #tpu.memory_space<vmem>>, vector<16x48xf32>
    %11 = arith.truncf %10 : vector<16x48xf32> to vector<16x48xbf16>
    %c0_5 = arith.constant 0 : index
    %c0_6 = arith.constant 0 : index
    %c0_7 = arith.constant 0 : index
    %12 = vector.load %arg20[%c0_5, %c0_6, %c0_7] : memref<1x48x512xbf16, #tpu.memory_space<vmem>>, vector<1x48x512xbf16>
    %13 = vector.shape_cast %12 : vector<1x48x512xbf16> to vector<48x512xbf16>
    %cst = arith.constant dense<0.000000e+00> : vector<16x512xf32>
    %14 = tpu.matmul %11, %13, %cst {dimension_numbers = #tpu.dot_dimension_numbers<[1], [0], [0], [1], [0, 0, 1, 1], [], []>} : vector<16x48xbf16>, vector<48x512xbf16>, vector<16x512xf32> -> vector<16x512xf32>
    %c0_8 = arith.constant 0 : index
    %c0_9 = arith.constant 0 : index
    %c0_10 = arith.constant 0 : index
    %15 = vector.load %arg21[%c0_8, %c0_9, %c0_10] : memref<1x1x512xf32, #tpu.memory_space<vmem>>, vector<1x1x512xf32>
    %16 = vector.shape_cast %15 : vector<1x1x512xf32> to vector<1x512xf32>
    %17 = vector.broadcast %16 : vector<1x512xf32> to vector<16x512xf32>
    %18 = arith.addf %14, %17 : vector<16x512xf32>
    %cst_11 = arith.constant 5.000000e-01 : f32
    %19 = vector.broadcast %cst_11 : f32 to vector<16x512xf32>
    %20 = arith.mulf %19, %18 : vector<16x512xf32>
    %cst_12 = arith.constant 4.471500e-02 : f32
    %21 = vector.broadcast %cst_12 : f32 to vector<16x512xf32>
    %22 = arith.mulf %21, %18 : vector<16x512xf32>
    %23 = arith.mulf %22, %18 : vector<16x512xf32>
    %24 = arith.mulf %23, %18 : vector<16x512xf32>
    %25 = arith.addf %18, %24 : vector<16x512xf32>
    %cst_13 = arith.constant 0.797884583 : f32
    %26 = vector.broadcast %cst_13 : f32 to vector<16x512xf32>
    %27 = arith.mulf %26, %25 : vector<16x512xf32>
    %28 = math.tanh %27 : vector<16x512xf32>
    %cst_14 = arith.constant 1.000000e+00 : f32
    %29 = vector.broadcast %cst_14 : f32 to vector<16x512xf32>
    %30 = arith.addf %29, %28 : vector<16x512xf32>
    %31 = arith.mulf %20, %30 : vector<16x512xf32>
    %c0_15 = arith.constant 0 : index
    %c0_16 = arith.constant 0 : index
    %32 = vector.load %arg31[%c0_15, %c0_16] : memref<16x48xf32, #tpu.memory_space<vmem>>, vector<16x48xf32>
    %33 = arith.truncf %31 : vector<16x512xf32> to vector<16x512xbf16>
    %c0_17 = arith.constant 0 : index
    %c0_18 = arith.constant 0 : index
    %c0_19 = arith.constant 0 : index
    %34 = vector.load %arg22[%c0_17, %c0_18, %c0_19] : memref<1x512x48xbf16, #tpu.memory_space<vmem>>, vector<1x512x48xbf16>
    %35 = vector.shape_cast %34 : vector<1x512x48xbf16> to vector<512x48xbf16>
    %cst_20 = arith.constant dense<0.000000e+00> : vector<16x48xf32>
    %36 = tpu.matmul %33, %35, %cst_20 {dimension_numbers = #tpu.dot_dimension_numbers<[1], [0], [0], [1], [0, 0, 1, 1], [], []>} : vector<16x512xbf16>, vector<512x48xbf16>, vector<16x48xf32> -> vector<16x48xf32>
    %37 = arith.addf %32, %36 : vector<16x48xf32>
    %c0_21 = arith.constant 0 : index
    %c0_22 = arith.constant 0 : index
    %38 = vector.load %arg31[%c0_21, %c0_22] : memref<16x48xf32, #tpu.memory_space<vmem>>, vector<16x48xf32>
    tpu.vector_store %arg31[%c0_21, %c0_22], %37 {strides = array<i32>} : memref<16x48xf32, #tpu.memory_space<vmem>>, vector<16x48xf32>,
    %39 = arith.extui %0 : i1 to i32
    %c0_i32_23 = arith.constant 0 : i32
    %40 = arith.cmpi ne, %39, %c0_i32_23 : i32
    scf.if %40 {
      %c0_25 = arith.constant 0 : index
      %c0_26 = arith.constant 0 : index
      %44 = vector.load %arg31[%c0_25, %c0_26] : memref<16x48xf32, #tpu.memory_space<vmem>>, vector<16x48xf32>
      %c0_27 = arith.constant 0 : index
      %c0_28 = arith.constant 0 : index
      %c0_29 = arith.constant 0 : index
      %45 = vector.load %arg23[%c0_27, %c0_28, %c0_29] : memref<1x1x48xf32, #tpu.memory_space<vmem>>, vector<1x1x48xf32>
      %46 = vector.shape_cast %45 : vector<1x1x48xf32> to vector<1x48xf32>
      %47 = vector.broadcast %46 : vector<1x48xf32> to vector<16x48xf32>
      %48 = arith.addf %44, %47 : vector<16x48xf32>
      %c0_30 = arith.constant 0 : index
      %c0_31 = arith.constant 0 : index
      %49 = vector.load %arg30[%c0_30, %c0_31] : memref<16x48xf32, #tpu.memory_space<vmem>>, vector<16x48xf32>
      %50 = arith.addf %48, %49 : vector<16x48xf32>
      %c0_32 = arith.constant 0 : index
      %c0_33 = arith.constant 0 : index
      %c0_34 = arith.constant 0 : index
      %51 = vector.load %arg24[%c0_32, %c0_33, %c0_34] : memref<1x1x48xf32, #tpu.memory_space<vmem>>, vector<1x1x48xf32>
      %52 = vector.shape_cast %51 : vector<1x1x48xf32> to vector<1x48xf32>
      %c0_35 = arith.constant 0 : index
      %c0_36 = arith.constant 0 : index
      %c0_37 = arith.constant 0 : index
      %53 = vector.load %arg25[%c0_35, %c0_36, %c0_37] : memref<1x1x48xf32, #tpu.memory_space<vmem>>, vector<1x1x48xf32>
      %54 = vector.shape_cast %53 : vector<1x1x48xf32> to vector<1x48xf32>
      %cst_38 = arith.constant dense<0.000000e+00> : vector<16xf32>
      %55 = vector.multi_reduction <add>, %50, %cst_38 [1] : vector<16x48xf32> to vector<16xf32>
      %56 = vector.shape_cast %55 : vector<16xf32> to vector<16x1xf32>
      %cst_39 = arith.constant 4.800000e+01 : f32
      %57 = vector.broadcast %cst_39 : f32 to vector<16x1xf32>
      %58 = arith.divf %56, %57 : vector<16x1xf32>
      %59 = vector.broadcast %58 : vector<16x1xf32> to vector<16x48xf32>
      %60 = arith.subf %50, %59 : vector<16x48xf32>
      %61 = arith.mulf %60, %60 : vector<16x48xf32>
      %cst_40 = arith.constant dense<0.000000e+00> : vector<16xf32>
      %62 = vector.multi_reduction <add>, %61, %cst_40 [1] : vector<16x48xf32> to vector<16xf32>
      %63 = vector.shape_cast %62 : vector<16xf32> to vector<16x1xf32>
      %cst_41 = arith.constant 4.800000e+01 : f32
      %64 = vector.broadcast %cst_41 : f32 to vector<16x1xf32>
      %65 = arith.divf %63, %64 : vector<16x1xf32>
      %66 = vector.broadcast %58 : vector<16x1xf32> to vector<16x48xf32>
      %67 = arith.subf %50, %66 : vector<16x48xf32>
      %cst_42 = arith.constant 9.99999996E-13 : f32
      %68 = vector.broadcast %cst_42 : f32 to vector<16x1xf32>
      %69 = arith.addf %65, %68 : vector<16x1xf32>
      %70 = math.rsqrt %69 : vector<16x1xf32>
      %71 = vector.broadcast %70 : vector<16x1xf32> to vector<16x48xf32>
      %72 = arith.mulf %67, %71 : vector<16x48xf32>
      %73 = vector.broadcast %52 : vector<1x48xf32> to vector<16x48xf32>
      %74 = arith.mulf %72, %73 : vector<16x48xf32>
      %75 = vector.broadcast %54 : vector<1x48xf32> to vector<16x48xf32>
      %76 = arith.addf %74, %75 : vector<16x48xf32>
      %c0_43 = arith.constant 0 : index
      %c0_44 = arith.constant 0 : index
      %77 = vector.load %arg29[%c0_43, %c0_44] : memref<16x48xf32, #tpu.memory_space<vmem>>, vector<16x48xf32>
      tpu.vector_store %arg29[%c0_43, %c0_44], %76 {strides = array<i32>} : memref<16x48xf32, #tpu.memory_space<vmem>>, vector<16x48xf32>,
    } else {
    }
    %41 = arith.andi %0, %1 : i1
    %42 = arith.extui %41 : i1 to i32
    %c0_i32_24 = arith.constant 0 : i32
    %43 = arith.cmpi ne, %42, %c0_i32_24 : i32
    scf.if %43 {
      %c0_25 = arith.constant 0 : index
      %c0_26 = arith.constant 0 : index
      %44 = vector.load %arg29[%c0_25, %c0_26] : memref<16x48xf32, #tpu.memory_space<vmem>>, vector<16x48xf32>
      %c0_27 = arith.constant 0 : index
      %c0_28 = arith.constant 0 : index
      %45 = vector.load %arg26[%c0_27, %c0_28] : memref<1x48xf32, #tpu.memory_space<vmem>>, vector<1x48xf32>
      %46 = vector.broadcast %45 : vector<1x48xf32> to vector<16x48xf32>
      %47 = arith.mulf %44, %46 : vector<16x48xf32>
      %cst_29 = arith.constant dense<0.000000e+00> : vector<16xf32>
      %48 = vector.multi_reduction <add>, %47, %cst_29 [1] : vector<16x48xf32> to vector<16xf32>
      %49 = vector.shape_cast %48 : vector<16xf32> to vector<16x1xf32>
      %c0_30 = arith.constant 0 : index
      %c0_31 = arith.constant 0 : index
      %50 = vector.load %arg27[%c0_30, %c0_31] : memref<1x1xf32, #tpu.memory_space<vmem>>, vector<1x1xf32>
      %51 = vector.broadcast %50 : vector<1x1xf32> to vector<16x1xf32>
      %52 = arith.addf %49, %51 : vector<16x1xf32>
      %53 = arith.negf %52 : vector<16x1xf32>
      %54 = math.exp %53 : vector<16x1xf32>
      %cst_32 = arith.constant 1.000000e+00 : f32
      %55 = vector.broadcast %cst_32 : f32 to vector<16x1xf32>
      %56 = arith.addf %55, %54 : vector<16x1xf32>
      %57 = arith.divf %55, %56 : vector<16x1xf32>
      %c0_33 = arith.constant 0 : index
      %c0_34 = arith.constant 0 : index
      %58 = vector.load %arg28[%c0_33, %c0_34] : memref<16x1xf32, #tpu.memory_space<vmem>>, vector<16x1xf32>
      tpu.vector_store %arg28[%c0_33, %c0_34], %57 {strides = array<i32>} : memref<16x1xf32, #tpu.memory_space<vmem>>, vector<16x1xf32>,
    } else {
    }
    return
  }
  func.func @transform_0(%arg0: i32, %arg1: i32) -> (i32, i32) {
    %c0_i32 = arith.constant 0 : i32
    %c0_i32_0 = arith.constant 0 : i32
    %c0_i32_1 = arith.constant 0 : i32
    return %c0_i32, %c0_i32_0 : i32, i32
  }
  func.func @transform_1(%arg0: i32, %arg1: i32) -> (i32, i32) {
    %c0_i32 = arith.constant 0 : i32
    %c0_i32_0 = arith.constant 0 : i32
    %c0_i32_1 = arith.constant 0 : i32
    return %c0_i32, %c0_i32_0 : i32, i32
  }
  func.func @transform_2(%arg0: i32, %arg1: i32) -> (i32, i32) {
    %c0_i32 = arith.constant 0 : i32
    %c0_i32_0 = arith.constant 0 : i32
    %c0_i32_1 = arith.constant 0 : i32
    return %c0_i32, %c0_i32_0 : i32, i32
  }
  func.func @transform_3(%arg0: i32, %arg1: i32) -> (i32, i32) {
    %c0_i32 = arith.constant 0 : i32
    %c0_i32_0 = arith.constant 0 : i32
    %c0_i32_1 = arith.constant 0 : i32
    return %c0_i32, %c0_i32_0 : i32, i32
  }
  func.func @transform_4(%arg0: i32, %arg1: i32) -> (i32, i32) {
    %c0_i32 = arith.constant 0 : i32
    %c0_i32_0 = arith.constant 0 : i32
    %c0_i32_1 = arith.constant 0 : i32
    return %c0_i32, %c0_i32_0 : i32, i32
  }
  func.func @transform_5(%arg0: i32, %arg1: i32) -> (i32, i32) {
    %c0_i32 = arith.constant 0 : i32
    %c0_i32_0 = arith.constant 0 : i32
    %c0_i32_1 = arith.constant 0 : i32
    return %c0_i32, %c0_i32_0 : i32, i32
  }
  func.func @transform_6(%arg0: i32, %arg1: i32) -> (i32, i32) {
    %c0_i32 = arith.constant 0 : i32
    %c0_i32_0 = arith.constant 0 : i32
    %c0_i32_1 = arith.constant 0 : i32
    return %c0_i32, %c0_i32_0 : i32, i32
  }
  func.func @transform_7(%arg0: i32, %arg1: i32) -> (i32, i32) {
    %c0_i32 = arith.constant 0 : i32
    %c0_i32_0 = arith.constant 0 : i32
    %c0_i32_1 = arith.constant 0 : i32
    return %c0_i32, %c0_i32_0 : i32, i32
  }
  func.func @transform_8(%arg0: i32, %arg1: i32) -> (i32, i32, i32, i32) {
    %c0_i32 = arith.constant 0 : i32
    %c0_i32_0 = arith.constant 0 : i32
    %c0_i32_1 = arith.constant 0 : i32
    %c0_i32_2 = arith.constant 0 : i32
    return %arg0, %c0_i32, %c0_i32_0, %c0_i32_1 : i32, i32, i32, i32
  }
  func.func @transform_9(%arg0: i32, %arg1: i32) -> (i32, i32, i32, i32) {
    %c0_i32 = arith.constant 0 : i32
    %c0_i32_0 = arith.constant 0 : i32
    %c0_i32_1 = arith.constant 0 : i32
    %c0_i32_2 = arith.constant 0 : i32
    return %arg0, %c0_i32, %c0_i32_0, %c0_i32_1 : i32, i32, i32, i32
  }
  func.func @transform_10(%arg0: i32, %arg1: i32) -> (i32, i32, i32, i32) {
    %c0_i32 = arith.constant 0 : i32
    %c0_i32_0 = arith.constant 0 : i32
    %c0_i32_1 = arith.constant 0 : i32
    %c0_i32_2 = arith.constant 0 : i32
    return %arg0, %c0_i32, %c0_i32_0, %c0_i32_1 : i32, i32, i32, i32
  }
  func.func @transform_11(%arg0: i32, %arg1: i32) -> (i32, i32, i32, i32) {
    %c0_i32 = arith.constant 0 : i32
    %c0_i32_0 = arith.constant 0 : i32
    %c0_i32_1 = arith.constant 0 : i32
    %c0_i32_2 = arith.constant 0 : i32
    return %arg0, %c0_i32, %c0_i32_0, %c0_i32_1 : i32, i32, i32, i32
  }
  func.func @transform_12(%arg0: i32, %arg1: i32) -> (i32, i32, i32, i32) {
    %c0_i32 = arith.constant 0 : i32
    %c0_i32_0 = arith.constant 0 : i32
    %c0_i32_1 = arith.constant 0 : i32
    %c0_i32_2 = arith.constant 0 : i32
    return %arg0, %c0_i32, %c0_i32_0, %c0_i32_1 : i32, i32, i32, i32
  }
  func.func @transform_13(%arg0: i32, %arg1: i32) -> (i32, i32, i32, i32) {
    %c0_i32 = arith.constant 0 : i32
    %c0_i32_0 = arith.constant 0 : i32
    %c0_i32_1 = arith.constant 0 : i32
    %c0_i32_2 = arith.constant 0 : i32
    return %arg0, %c0_i32, %c0_i32_0, %c0_i32_1 : i32, i32, i32, i32
  }
  func.func @transform_14(%arg0: i32, %arg1: i32) -> (i32, i32, i32, i32) {
    %c0_i32 = arith.constant 0 : i32
    %c0_i32_0 = arith.constant 0 : i32
    %c0_i32_1 = arith.constant 0 : i32
    %c0_i32_2 = arith.constant 0 : i32
    return %arg0, %c0_i32, %c0_i32_0, %c0_i32_1 : i32, i32, i32, i32
  }
  func.func @transform_15(%arg0: i32, %arg1: i32) -> (i32, i32, i32) {
    %c0_i32 = arith.constant 0 : i32
    %c0_i32_0 = arith.constant 0 : i32
    %c0_i32_1 = arith.constant 0 : i32
    return %arg0, %c0_i32, %c0_i32_0 : i32, i32, i32
  }
  func.func @transform_16(%arg0: i32, %arg1: i32) -> (i32, i32, i32) {
    %c0_i32 = arith.constant 0 : i32
    %c0_i32_0 = arith.constant 0 : i32
    %c0_i32_1 = arith.constant 0 : i32
    return %arg0, %c0_i32, %c0_i32_0 : i32, i32, i32
  }
  func.func @transform_17(%arg0: i32, %arg1: i32) -> (i32, i32, i32) {
    %c0_i32 = arith.constant 0 : i32
    %c0_i32_0 = arith.constant 0 : i32
    %c0_i32_1 = arith.constant 0 : i32
    return %arg0, %c0_i32, %c0_i32_0 : i32, i32, i32
  }
  func.func @transform_18(%arg0: i32, %arg1: i32) -> (i32, i32, i32) {
    %c0_i32 = arith.constant 0 : i32
    %c0_i32_0 = arith.constant 0 : i32
    return %arg0, %c0_i32, %arg1 : i32, i32, i32
  }
  func.func @transform_19(%arg0: i32, %arg1: i32) -> (i32, i32, i32) {
    %c0_i32 = arith.constant 0 : i32
    %c0_i32_0 = arith.constant 0 : i32
    return %arg0, %c0_i32, %arg1 : i32, i32, i32
  }
  func.func @transform_20(%arg0: i32, %arg1: i32) -> (i32, i32, i32) {
    %c0_i32 = arith.constant 0 : i32
    %c0_i32_0 = arith.constant 0 : i32
    return %arg0, %arg1, %c0_i32 : i32, i32, i32
  }
  func.func @transform_21(%arg0: i32, %arg1: i32) -> (i32, i32, i32) {
    %c0_i32 = arith.constant 0 : i32
    %c0_i32_0 = arith.constant 0 : i32
    %c0_i32_1 = arith.constant 0 : i32
    return %arg0, %c0_i32, %c0_i32_0 : i32, i32, i32
  }
  func.func @transform_22(%arg0: i32, %arg1: i32) -> (i32, i32, i32) {
    %c0_i32 = arith.constant 0 : i32
    %c0_i32_0 = arith.constant 0 : i32
    %c0_i32_1 = arith.constant 0 : i32
    return %arg0, %c0_i32, %c0_i32_0 : i32, i32, i32
  }
  func.func @transform_23(%arg0: i32, %arg1: i32) -> (i32, i32, i32) {
    %c0_i32 = arith.constant 0 : i32
    %c0_i32_0 = arith.constant 0 : i32
    %c0_i32_1 = arith.constant 0 : i32
    return %arg0, %c0_i32, %c0_i32_0 : i32, i32, i32
  }
  func.func @transform_24(%arg0: i32, %arg1: i32) -> (i32, i32) {
    %c0_i32 = arith.constant 0 : i32
    %c0_i32_0 = arith.constant 0 : i32
    %c0_i32_1 = arith.constant 0 : i32
    return %c0_i32, %c0_i32_0 : i32, i32
  }
  func.func @transform_25(%arg0: i32, %arg1: i32) -> (i32, i32) {
    %c0_i32 = arith.constant 0 : i32
    %c0_i32_0 = arith.constant 0 : i32
    %c0_i32_1 = arith.constant 0 : i32
    return %c0_i32, %c0_i32_0 : i32, i32
  }
  func.func @transform_26(%arg0: i32, %arg1: i32) -> (i32, i32) {
    %c0_i32 = arith.constant 0 : i32
    %c0_i32_0 = arith.constant 0 : i32
    %c0_i32_1 = arith.constant 0 : i32
    return %c0_i32, %c0_i32_0 : i32, i32
  }
}

</mosaic_0001>

<bundles_post_ra>
// kernel: bert_forward.1
= control target key start
LH: loop header
LB: loop body
LE: loop exit
PB: predicated region body
PF: predicated region fallthrough
CT: control target
= control target key end

     0   :  { %s6475_s0 = inlined_call_operand.vmem [shape: f32[16,80], index: 0, kind: input, shape index: {}]   ;;  %s6476_s1 = inlined_call_operand.vmem [shape: f32[16,16], index: 1, kind: input, shape index: {}]   ;;  %s6477_s2 = inlined_call_operand.vmem [shape: f32[80,48], index: 2, kind: input, shape index: {}]   ;;  %s6478_s3 = inlined_call_operand.vmem [shape: f32[1,48], index: 3, kind: input, shape index: {}]   ;;  %s6479_s4 = inlined_call_operand.vmem [shape: f32[16,48], index: 4, kind: input, shape index: {}]   ;;  %s6480_s5 = inlined_call_operand.vmem [shape: f32[1,48], index: 5, kind: input, shape index: {}]   ;;  %s6481_s6 = inlined_call_operand.vmem [shape: f32[1,48], index: 6, kind: input, shape index: {}]   ;;  %s6482_s7 = inlined_call_operand.vmem [shape: f32[1,48], index: 7, kind: input, shape index: {}]   ;;  %s6483_s8 = inlined_call_operand.vmem [shape: f32[2,4,48,12], index: 8, kind: input, shape index: {}]   ;;  %s6484_s9 = inlined_call_operand.vmem [shape: f32[2,4,1,12], index: 9, kind: input, shape index: {}]   ;;  %s6485_s10 = inlined_call_operand.vmem [shape: f32[2,4,48,12], index: 10, kind: input, shape index: {}]   ;;  %s6486_s11 = inlined_call_operand.vmem [shape: f32[2,4,1,12], index: 11, kind: input, shape index: {}]   ;;  %s6487_s12 = inlined_call_operand.vmem [shape: f32[2,4,48,12], index: 12, kind: input, shape index: {}]   ;;  %s6488_s13 = inlined_call_operand.vmem [shape: f32[2,4,1,12], index: 13, kind: input, shape index: {}]   ;;  %s6489_s14 = inlined_call_operand.vmem [shape: f32[2,4,12,48], index: 14, kind: input, shape index: {}]   ;;  %s6490_s15 = inlined_call_operand.vmem [shape: f32[2,1,48], index: 15, kind: input, shape index: {}]   ;;  %s6491_s16 = inlined_call_operand.vmem [shape: f32[2,1,48], index: 16, kind: input, shape index: {}]   ;;  %s6492_s17 = inlined_call_operand.vmem [shape: f32[2,1,48], index: 17, kind: input, shape index: {}]   ;;  %s6493_s18 = inlined_call_operand.vmem [shape: bf16[2,48,3072], index: 18, kind: input, shape index: {}]   ;;  %s6494_s19 = inlined_call_operand.vmem [shape: f32[2,1,3072], index: 19, kind: input, shape index: {}]   ;;  %s6495_s20 = inlined_call_operand.vmem [shape: bf16[2,3072,48], index: 20, kind: input, shape index: {}]   ;;  %s6496_s21 = inlined_call_operand.vmem [shape: f32[2,1,48], index: 21, kind: input, shape index: {}]   ;;  %s6497_s22 = inlined_call_operand.vmem [shape: f32[2,1,48], index: 22, kind: input, shape index: {}]   ;;  %s6498_s23 = inlined_call_operand.vmem [shape: f32[2,1,48], index: 23, kind: input, shape index: {}]   ;;  %s6499_s24 = inlined_call_operand.vmem [shape: f32[1,48], index: 24, kind: input, shape index: {}]   ;;  %s6500_s25 = inlined_call_operand.<no memory space> [shape: f32[1,1], index: 25, kind: input, shape index: {}]   ;;  %s6501_s26 = inlined_call_operand.vmem [shape: f32[16,1], index: 26, kind: output, shape index: {}]  }
   0x1   :  { %6515 = sst [smem:[#allocation16_spill]] %s6475_s0  ;;  %v31_v0 = vstv %s6500_s25 }
   0x2   :  { %6516 = sst [smem:[#allocation17_spill]] %s6476_s1  ;;  %32 = vst [vmem:[#allocation5] sm:$0x1] %v31_v0 }
   0x3   :  { %6517 = sst [smem:[#allocation18_spill]] %s6477_s2 }
   0x4   :  { %6518 = sst [smem:[#allocation19_spill]] %s6478_s3 }
   0x5   :  { %6519 = sst [smem:[#allocation20_spill]] %s6479_s4 }
   0x6   :  { %6520 = sst [smem:[#allocation21_spill]] %s6480_s5 }
   0x7   :  { %6521 = sst [smem:[#allocation22_spill]] %s6481_s6 }
   0x8   :  { %6522 = sst [smem:[#allocation23_spill]] %s6482_s7 }
   0x9   :  { %6523 = sst [smem:[#allocation24_spill]] %s6483_s8 }
   0xa   :  { %6524 = sst [smem:[#allocation25_spill]] %s6484_s9 }
   0xb   :  { %6525 = sst [smem:[#allocation26_spill]] %s6485_s10 }
   0xc   :  { %6526 = sst [smem:[#allocation27_spill]] %s6486_s11 }
   0xd   :  { %6527 = sst [smem:[#allocation28_spill]] %s6487_s12 }
   0xe   :  { %6528 = sst [smem:[#allocation29_spill]] %s6488_s13 }
   0xf   :  { %6529 = sst [smem:[#allocation30_spill]] %s6489_s14 }
  0x10   :  { %6530 = sst [smem:[#allocation31_spill]] %s6490_s15 }
  0x11   :  { %6531 = sst [smem:[#allocation32_spill]] %s6491_s16 }
  0x12   :  { %6532 = sst [smem:[#allocation33_spill]] %s6492_s17 }
  0x13   :  { %6533 = sst [smem:[#allocation34_spill]] %s6493_s18 }
  0x14   :  { %6534 = sst [smem:[#allocation35_spill]] %s6494_s19 }
  0x15   :  { %6535 = sst [smem:[#allocation36_spill]] %s6495_s20 }
  0x16   :  { %6536 = sst [smem:[#allocation37_spill]] %s6496_s21 }
  0x17   :  { %6537 = sst [smem:[#allocation38_spill]] %s6497_s22 }
  0x18   :  { %6538 = sst [smem:[#allocation39_spill]] %s6498_s23 }
  0x19   :  { %6539 = sst [smem:[#allocation40_spill]] %s6499_s24 }
  0x1a   :  { %6540 = sst [smem:[#allocation41_spill]] %s6501_s26 }
  0x1b   :  { %s5817_s7 = smov 0   ;;  %s5819_s28 = smov 0  }
  0x1c   :  { %s5821_s8 = smov 0   ;;  %s5823_s4 = smov 0  }
  0x1d   :  { %s5825_s29 = smov 0   ;;  %s5827_s0 = smov 0  }
  0x1e   :  { %s5829_s9 = smov 0  }
  0x1f LB: > { %6541 = sst [smem:[#allocation7_spill]] %s5654_s28  ;;  %s47_s25 = sadd.s32 1, %s5666_s29  ;;  %s5674_s9 = sphi %s5829_s9, %s38_s9   ;;  %s5670_s0 = sphi %s5827_s0, %s6600_s0   ;;  %s5666_s29 = sphi %s5825_s29, %s6599_s29   ;;  %s5662_s4 = sphi %s5823_s4, %s6598_s4   ;;  %s5658_s8 = sphi %s5821_s8, %s6597_s8   ;;  %s5654_s28 = sphi %s5819_s28, %s6596_s28   ;;  %s5650_s7 = sphi %s5817_s7, %s6595_s7  }
  0x20   : > { %6542 = sst [smem:[#allocation8_spill]] %s5666_s29  ;;  %p48_p0 = scmp.ge.s32.totalorder %s47_s25, 6 }
  0x21   : > { %6543 = sst [smem:[#allocation9_spill]] %s5670_s0  ;;  %s50_s30 = sadd.s32 1, %s5670_s0 }
  0x22   : > { %6544 = sst [smem:[#allocation10_spill]] %s5674_s9  ;;  %p494_p1 = scmp.ne.s32.totalorder %s5654_s28, %s5650_s7 }
  0x23   : > { %p495_p2 = scmp.eq.s32.totalorder %s5674_s9, 0  ;;  %s6602_s25 = smov (%p48_p0, %s47_s25), 0 }
  0x24   : > { %6545 = sst [smem:[#allocation11_spill]] %s6602_s25  ;;  %s6604_s30 = smov (!%p48_p0, %s50_s30), %s5670_s0 }
  0x25   : > { %p496_p3 = por %p495_p2, %p494_p1  ;;  %p52_p4 = scmp.ge.s32.totalorder %s6604_s30, 2 }
  0x26   : > { %s483_s2 = ssub.s32 %s5666_s29, %s6602_s25  ;;  %s487_s6 = sadd.s32 1, %s5654_s28 }
  0x27   : > { %s6606_s30 = smov (%p52_p4, %s6604_s30), 0  ;;  %p4493_p6 = scmp.ge.s32.totalorder %s5674_s9, 12 }
  0x28   : > { %6546 = sst [smem:[#allocation12_spill]] %s6606_s30  ;;  %s482_s5 = ssub.s32 %s5670_s0, %s6606_s30 }
  0x29   : > { %s484_s10 = sor.u32 %s483_s2, %s482_s5  ;;  %747 = sbr.rel (%p4493_p6) target bundleno = 64 (0x40), region = 56 }
  0x2a   : > { %p485_p5 = scmp.eq.s32.totalorder %s484_s10, 0 }
  0x2c   : > { %s5868_s1 = scalar_select %p485_p5, %s5654_s28, %s487_s6  }
  0x2e   : > { %6547 = sst [smem:[#allocation13_spill]] %s5868_s1 }
  0x30   : > { %821 = sbr.rel (!%p496_p3) target bundleno = 64 (0x40), region = 100  ;;  %s823_s27 = sand.u32 (%p496_p3), 1, %s5654_s28  }
  0x31   : > { %s5437_s3 = smul.u32 (%p496_p3), 96, %s823_s27  ;;  %s4494_s26 = sshll.u32 (%p496_p3), %s5666_s29, 2 }
  0x32   : > { %s5438_s25 = smul.u32 (%p496_p3), 144, %s5670_s0  ;;  %s6548_s18 = sld [smem:[#allocation34_spill]] (%p496_p3) }
  0x33   : > { %s825_s5 = scalar_lea.vmem (%p496_p3), [#allocation6], %s5437_s3 }
  0x34   : > { %s828_s24 = sadd.s32 (%p496_p3), %s5438_s25, %s4494_s26 }
  0x35   : > { %s4495_s20 = sshll.u32 (%p496_p3), %s828_s24, 2 }
  0x38   : > { %s830_s2 = scalar_lea.vmem %s6548_s18, %s4495_s20 }
  0x39   : > { %v843_v1 = vld [vmem:[%s830_s2] sm:$0xff]  ;;  %v845_v2 = vld [vmem:[%s830_s2 + $0x8] sm:$0xff] }
  0x3a   : > { %v847_v3 = vld [vmem:[%s830_s2 + $0x60] sm:$0xff]  ;;  %844 = vst [vmem:[%s825_s5] sm:$0xff] %v843_v1  ;;  %846 = vst [vmem:[%s825_s5 + $0x8] sm:$0xff] %v845_v2  ;;  %v849_v4 = vld [vmem:[%s830_s2 + $0x68] sm:$0xff] }
  0x3b   : > { %848 = vst [vmem:[%s825_s5 + $0x10] sm:$0xff] %v847_v3  ;;  %v851_v5 = vld [vmem:[%s830_s2 + $0xc0] sm:$0xff]  ;;  %v853_v6 = vld [vmem:[%s830_s2 + $0xc8] sm:$0xff]  ;;  %850 = vst [vmem:[%s825_s5 + $0x18] sm:$0xff] %v849_v4 }
  0x3c   : > { %852 = vst [vmem:[%s825_s5 + $0x20] sm:$0xff] %v851_v5  ;;  %854 = vst [vmem:[%s825_s5 + $0x28] sm:$0xff] %v853_v6  ;;  %v855_v7 = vld [vmem:[%s830_s2 + $0x120] sm:$0xff]  ;;  %v857_v8 = vld [vmem:[%s830_s2 + $0x128] sm:$0xff] }
  0x3d   : > { %v859_v9 = vld [vmem:[%s830_s2 + $0x180] sm:$0xff]  ;;  %856 = vst [vmem:[%s825_s5 + $0x30] sm:$0xff] %v855_v7  ;;  %858 = vst [vmem:[%s825_s5 + $0x38] sm:$0xff] %v857_v8  ;;  %v861_v10 = vld [vmem:[%s830_s2 + $0x188] sm:$0xff] }
  0x3e   : > { %860 = vst [vmem:[%s825_s5 + $0x40] sm:$0xff] %v859_v9  ;;  %v863_v11 = vld [vmem:[%s830_s2 + $0x1e0] sm:$0xff]  ;;  %v865_v12 = vld [vmem:[%s830_s2 + $0x1e8] sm:$0xff]  ;;  %862 = vst [vmem:[%s825_s5 + $0x48] sm:$0xff] %v861_v10 }
  0x3f   : > { %864 = vst [vmem:[%s825_s5 + $0x50] sm:$0xff] %v863_v11  ;;  %866 = vst [vmem:[%s825_s5 + $0x58] sm:$0xff] %v865_v12 }
  0x40 PF: > { %p4496_p7 = scmp.ge.s32.totalorder %s5674_s9, 1  ;;  %p914_p8 = scmp.lt.s32.totalorder %s5674_s9, 13 }
  0x42   : > { %p915_p9 = pnand %p4496_p7, %p914_p8 }
  0x44   : > { %918 = sbr.rel (%p915_p9) target bundleno = 5905 (0x1711), region = 143 }
  0x4b   : > { %s921_s20 = sand.u32 1, %s5650_s7   ;;  %p1052_p10 = scmp.lt.s32.totalorder %s5662_s4, 1 }
  0x4c   : > { %s5881_s23 = smul.u32 96, %s921_s20  ;;  %s4505_s24 = sshll.u32 %s5658_s8, 2 }
  0x4d   : > { %s5885_s26 = scalar_select %p1052_p10, %s5662_s4, 1 }
  0x4e   : > { %p5887_p11 = scmp.lt.s32.totalorder %s4505_s24, 23  ;;  %s6550_s27 = sld [smem:[#allocation25_spill]] }
  0x4f   : > { %s5440_s7 = smul.u32 192, %s5885_s26  ;;  %s4498_s30 = sshll.u32 %s5885_s26, 2 }
  0x50   : > { %s6551_s11 = sld [smem:[#allocation27_spill]]  ;;  %s6552_s29 = sld [smem:[#allocation24_spill]] }
  0x51   : > { %s6553_s22 = sld [smem:[#allocation26_spill]]  ;;  %s6554_s12 = sld [smem:[#allocation28_spill]] }
  0x52   : > { %s6555_s13 = sld [smem:[#allocation29_spill]]  ;;  %s4715_s18 = sshll.u32 %s5885_s26, 6 }
  0x53   : > { %s6558_s14 = sld [smem:[#allocation30_spill]]  ;;  %s6608_s24 = smov (!%p5887_p11, %s4505_s24), 23 }
  0x54   : > { %s5896_s3 = scalar_lea.vmem %s6550_s27, %s4498_s30  ;;  %s5442_s0 = smul.u32 384, %s5885_s26 }
  0x55   : > { %s6562_s19 = sld [smem:[#allocation35_spill]]  ;;  %s6563_s2 = sld [smem:[#allocation37_spill]] }
  0x56   : > { %s5901_s20 = scalar_lea.vmem %s6551_s11, %s4498_s30  ;;  %s5906_s1 = scalar_lea.vmem %s6552_s29, %s5440_s7 }
  0x57   : > { %s5911_s21 = scalar_lea.vmem %s6553_s22, %s5440_s7  ;;  %s5916_s6 = scalar_lea.vmem %s6554_s12, %s5440_s7 }
  0x58   : > { %s5921_s5 = scalar_lea.vmem %s6555_s13, %s4498_s30  ;;  %s5441_s12 = smul.u32 24, %s5885_s26 }
  0x59   : > { %6556 = sst [smem:[#allocation14_spill]] %s5921_s5  ;;  %s5931_s11 = scalar_lea.vmem %s6558_s14, %s4715_s18 }
  0x5a   : > { %6559 = sst [smem:[#allocation15_spill]] %s5931_s11  ;;  %s4506_s29 = sshll.u32 %s5658_s8, 6 }
  0x5b   : > { %s5946_s9 = sadd.s32 %s5441_s12, %s6608_s24  ;;  %p1106_p12 = scmp.lt.s32.totalorder %s4506_s29, 383 }
  0x5c   : > { %s1101_s7 = scalar_lea.vmem %s6562_s19, %s5946_s9  ;;  %s1115_s30 = scalar_lea.vmem %s6563_s2, %s5885_s26 }
  0x5d   : > { %s6610_s29 = smov (!%p1106_p12, %s4506_s29), 383  ;;  %s6564_s13 = sld [smem:[#allocation38_spill]] }
  0x5e   : > { %s6565_s15 = sld [smem:[#allocation39_spill]]  ;;  %s1109_s24 = sadd.s32 %s5442_s0, %s6610_s29 }
  0x5f   : > { %p1123_p13 = scmp.eq.s32.totalorder %s5658_s8, 5  ;;  %s4507_s11 = sshll.u32 %s1109_s24, 2 }
  0x60   : > { %p1124_p0 = scmp.eq.s32.totalorder %s5662_s4, 1  ;;  %s6566_s22 = sld [smem:[#allocation36_spill]] }
  0x61   : > { %p1125_p1 = scmp.eq.s32.totalorder %s5662_s4, 0  ;;  %p1126_p2 = scmp.eq.s32.totalorder %s5658_s8, 0 }
  0x62   : > { %s5974_s10 = scalar_lea.vmem [#allocation6], %s5881_s23 }
  0x63   : > { %s1118_s14 = scalar_lea.vmem %s6564_s13, %s5885_s26  ;;  %p1127_p3 = pnand %p1126_p2, %p1125_p1 }
  0x64   : > { %s1121_s12 = scalar_lea.vmem %s6565_s15, %s5885_s26  ;;  %s6567_s27 = sld [smem:[#allocation18_spill]] (!%p1127_p3)  ;;  %vm1150_vm0 = vcmask (!%p1127_p3), 654336   ;;  %vm1247_vm1 = vcmask (!%p1127_p3), 392192  }
  0x65   : > { %1130 = sbr.rel (%p1127_p3) target bundleno = 666 (0x29a), region = 151  ;;  %s6569_s24 = sld [smem:[#allocation19_spill]] (!%p1127_p3) }
  0x66   : > { %s5969_s19 = scalar_lea.vmem %s6566_s22, %s4507_s11  ;;  %s6568_s22 = sld [smem:[#allocation16_spill]] (!%p1127_p3) }
  0x67   : > { %s6570_s28 = sld [smem:[#allocation20_spill]] (!%p1127_p3)  ;;  %s6572_s5 = sld [smem:[#allocation21_spill]] (!%p1127_p3) }
  0x68   : > { %s6573_s2 = sld [smem:[#allocation22_spill]] (!%p1127_p3)  ;;  %s6574_s18 = sld [smem:[#allocation23_spill]] (!%p1127_p3) }
  0x6a   : > { %v1133_v13 = vld [vmem:[%s6567_s27] sm:$0xff] (!%p1127_p3)  ;;  %v1134_v14 = vld [vmem:[%s6567_s27 + $0x8] sm:$0xff] (!%p1127_p3)  ;;  %v1135_v15 = vld [vmem:[%s6567_s27 + $0x10] sm:$0xff] (!%p1127_p3) }
  0x6b   : > { %v5203_v16 = vpack.c.bf16 (!%p1127_p3), %v1134_v14, %v1133_v13  ;;  %v1136_v17 = vld [vmem:[%s6567_s27 + $0x18] sm:$0xff] (!%p1127_p3)  ;;  %v1137_v19 = vld [vmem:[%s6567_s27 + $0x20] sm:$0xff] (!%p1127_p3)  ;;  %v1138_v20 = vld [vmem:[%s6567_s27 + $0x28] sm:$0xff] (!%p1127_p3) }
  0x6c   : > { %v5207_v18 = vpack.c.bf16 %v1136_v17, %v1135_v15  ;;  %v1131_v21 = vld [vmem:[%s6568_s22] sm:$0xff]  ;;  %v5211_v22 = vpack.c.bf16 %v1138_v20, %v1137_v19  ;;  %v1139_v23 = vld [vmem:[%s6567_s27 + $0x30] sm:$0xff]  ;;  %v1140_v24 = vld [vmem:[%s6567_s27 + $0x38] sm:$0xff] }
  0x6d   : > { %5204 = vmatprep.subr.bf16.mxu0 %v5203_v16  ;;  %4936 = vmatprep.mubr.msk.f32.mxu0 %vm1150_vm0, %v1131_v21  ;;  %v5215_v25 = vpack.c.bf16 %v1140_v24, %v1139_v23  ;;  %v1141_v26 = vld [vmem:[%s6567_s27 + $0x40] sm:$0xff]  ;;  %v1142_v27 = vld [vmem:[%s6567_s27 + $0x48] sm:$0xff]  ;;  %s6571_s15 = smov %s6570_s28 }
  0x6e   : > { %5206 = vmatpush3.bf16.msra.mxu0 %v5203_v16  ;;  %v5219_v28 = vpack.c.bf16 %v1142_v27, %v1141_v26  ;;  %v1132_v29 = vld [vmem:[%s6568_s22 + $0x8] sm:$0xff]  ;;  %v4508_v30 = vld [vmem:[%s6569_s24] ss:$0 sm:$0xff] }
  0x6f   : > { %5208 = vmatprep.subr.bf16.mxu0 %v5207_v18  ;;  %v1233_v33 = vld [vmem:[%s6570_s28 + $0x8] sm:$0xff]  ;;  %v1232_v35 = vld [vmem:[%s6571_s15] sm:$0xff] }
  0x70   : > { %v4511_v37 = vld [vmem:[%s6572_s5] ss:$0 sm:$0xff] }
  0x71   : > { %v4512_v61 = vld [vmem:[%s6573_s2] ss:$0 sm:$0xff] }
  0x72   : > { %5210 = vmatpush3.bf16.msra.mxu0 %v5207_v18  ;;  %v4513_v63 = vld [vmem:[%s6574_s18] ss:$0 sm:$0xff] }
  0x73   : > { %5212 = vmatprep.subr.bf16.mxu0 %v5211_v22 }
  0x76   : > { %5214 = vmatpush3.bf16.msra.mxu0 %v5211_v22 }
  0x77   : > { %5216 = vmatprep.subr.bf16.mxu0 %v5215_v25 }
  0x7a   : > { %5218 = vmatpush3.bf16.msra.mxu0 %v5215_v25 }
  0x7b   : > { %5220 = vmatprep.subr.bf16.mxu0 %v5219_v28 }
  0x7e   : > { %5222 = vmatpush3.bf16.msra.mxu0 %v5219_v28 }
  0x81   : > { %4937 = vmatmul.mubr.msk.f32.vlgmr.msra.gmra.mrb[0].mxu0 %vm1150_vm0, %v1132_v29 }
 0x154   : > { %v4938_v31 = vpop.f32.mrb[0].mxu0 }
 0x155   : > { %v1229_v32 = vadd.f32 %v4938_v31, %v4508_v30  ;;  %v1223_v34 = vpop.f32.mrb[1].mxu0 }
 0x156   : > { %v1224_v36 = vadd.f32 %v4508_v30, %v1223_v34 }
 0x157   : > { %v1235_v38 = vadd.f32 %v1233_v33, %v1229_v32 }
 0x158   : > { %v1234_v39 = vadd.f32 %v1232_v35, %v1224_v36 }
 0x159   : > { %v1244_v42 = vadd.f32 %v4511_v37, %v1235_v38 }
 0x15a   : > { %v1243_v40 = vadd.f32 %v4511_v37, %v1234_v39 }
 0x15b   : > { %v1251_v43 = vsel %vm1247_vm1, %v1244_v42, 0.0 }
 0x15c   : > { %v1248_v41 = vsel %vm1247_vm1, %v1243_v40, 0.0 }
 0x15d   : > { %1249 = vadd.xlane.f32.xlu0 %v1248_v41 }
 0x161   : > { %1252 = vadd.xlane.f32.xlu0 %v1251_v43 }
 0x1ea   : > { %v1250_v44 = vpop.xlane.xlu0 %1249 }
 0x1eb   : > { %v1255_v45 = vmul.f32 0.020833334, %v1250_v44 }
 0x1ed   : > { %v1257_v46 = vsub.f32 %v1243_v40, %v1255_v45 }
 0x1ee   : > { %v1253_v47 = vpop.xlane.xlu0 %1252 }
 0x1ef   : > { %v1256_v48 = vmul.f32 0.020833334, %v1253_v47  ;;  %v1259_v49 = vmul.f32 %v1257_v46, %v1257_v46 }
 0x1f1   : > { %v1258_v50 = vsub.f32 %v1244_v42, %v1256_v48  ;;  %v1261_v51 = vsel %vm1247_vm1, %v1259_v49, 0.0 }
 0x1f2   : > { %1262 = vadd.xlane.f32.xlu1 %v1261_v51 }
 0x1f3   : > { %v1260_v52 = vmul.f32 %v1258_v50, %v1258_v50 }
 0x1f5   : > { %v1264_v53 = vsel %vm1247_vm1, %v1260_v52, 0.0 }
 0x1f6   : > { %1265 = vadd.xlane.f32.xlu1 %v1264_v53 }
 0x27f   : > { %v1263_v54 = vpop.xlane.xlu1 %1262 }
 0x280   : > { %v1267_v55 = vmul.f32 0.020833334, %v1263_v54 }
 0x282   : > { %v1269_v56 = vadd.f32 1e-12, %v1267_v55 }
 0x283   : > { %v1266_v57 = vpop.xlane.xlu1 %1265 }
 0x284   : > { %5502 = vrsqrt.f32 %v1269_v56  ;;  %v1268_v58 = vmul.f32 0.020833334, %v1266_v57 }
 0x286   : > { %v1270_v59 = vadd.f32 1e-12, %v1268_v58 }
 0x288   : > { %5504 = vrsqrt.f32 %v1270_v59 }
 0x28e   : > { %v5503_v60 = vpop.eup %5502 }
 0x28f   : > { %v1273_v62 = vmul.f32 %v5503_v60, %v1257_v46 }
 0x291   : > { %v1281_v0 = vmul.f32 %v4512_v61, %v1273_v62 }
 0x292   : > { %v5505_v1 = vpop.eup %5504 }
 0x293   : > { %v1289_v2 = vadd.f32 %v4513_v63, %v1281_v0  ;;  %v1274_v3 = vmul.f32 %v5505_v1, %v1258_v50 }
 0x295   : > { %1291 = vst.msk [vmem:[#allocation2] sm:$0xff] %vm1247_vm1, %v1289_v2  ;;  %v1282_v4 = vmul.f32 %v4512_v61, %v1274_v3 }
 0x297   : > { %v1290_v5 = vadd.f32 %v4513_v63, %v1282_v4 }
 0x299   : > { %1292 = vst.msk [vmem:[#allocation2 + $0x8] sm:$0xff] %vm1247_vm1, %v1290_v5 }
 0x29a PF: > { %p4514_p4 = scmp.ne.s32.totalorder %s5658_s8, 0 }
 0x29b   : > { %v1395_v6 = vld [vmem:[%s5911_s21] sm:$0xff] (!%p4514_p4)  ;;  %v1396_v7 = vld [vmem:[%s5911_s21 + $0x8] sm:$0xff] (!%p4514_p4)  ;;  %v1397_v8 = vld [vmem:[%s5911_s21 + $0x10] sm:$0xff] (!%p4514_p4)  ;;  %vm1313_vm2 = vcmask (!%p4514_p4), 392192   ;;  %v5676_v13 = vmov (!%p4514_p4), 0.0   ;;  %vm1571_vm3 = vcmask (!%p4514_p4), 97280  }
 0x29c   : > { %1295 = sbr.rel (%p4514_p4) target bundleno = 4907 (0x132b), region = 155  ;;  %v5235_v9 = vpack.c.bf16 (!%p4514_p4), %v1396_v7, %v1395_v6  ;;  %v1398_v10 = vld [vmem:[%s5911_s21 + $0x18] sm:$0xff] (!%p4514_p4)  ;;  %v1300_v11 = vld [vmem:[%s5906_s1] sm:$0xff] (!%p4514_p4)  ;;  %v1301_v12 = vld [vmem:[%s5906_s1 + $0x8] sm:$0xff] (!%p4514_p4)  ;;  %3553 = vst.msk [vmem:[#allocation4] sm:$0xff] (!%p4514_p4), %vm1313_vm2, %v5676_v13  ;;  %s6577_s16 = sld [smem:[#allocation17_spill]] (!%p4514_p4) }
 0x29d   : > { %3554 = vst.msk [vmem:[#allocation4 + $0x8] sm:$0xff] (!%p4514_p4), %vm1313_vm2, %v5676_v13  ;;  %v5239_v14 = vpack.c.bf16 (!%p4514_p4), %v1398_v10, %v1397_v8  ;;  %v5223_v15 = vpack.c.bf16 (!%p4514_p4), %v1301_v12, %v1300_v11  ;;  %v1399_v16 = vld [vmem:[%s5911_s21 + $0x20] sm:$0xff] (!%p4514_p4)  ;;  %v1400_v17 = vld [vmem:[%s5911_s21 + $0x28] sm:$0xff] (!%p4514_p4)  ;;  %v1302_v19 = vld [vmem:[%s5906_s1 + $0x10] sm:$0xff] (!%p4514_p4)  ;;  %vm1659_vm5 = vcmask (!%p4514_p4), 130048   ;;  %s6578_s11 = sld [smem:[#allocation14_spill]] (!%p4514_p4) }
 0x29e   : > { %v6049_v18 = vld [vmem:[#allocation2] sm:$0xff] (!%p4514_p4)  ;;  %5236 = vmatprep.subr.bf16.mxu1 (!%p4514_p4), %v5235_v9  ;;  %v1303_v20 = vld [vmem:[%s5906_s1 + $0x18] sm:$0xff] (!%p4514_p4)  ;;  %v1305_v23 = vld [vmem:[%s5906_s1 + $0x28] sm:$0xff] (!%p4514_p4)  ;;  %v5243_v24 = vpack.c.bf16 (!%p4514_p4), %v1400_v17, %v1399_v16  ;;  %s6579_s5 = sld [smem:[#allocation15_spill]] (!%p4514_p4)  ;;  %vm2234_vm6 = vcmask (!%p4514_p4), 1043456   ;;  %vm5677_vm7 = vmmov (!%p4514_p4), 1  }
 0x29f   : > { %4966 = vmatprep.mubr.msk.f32.mxu1 (!%p4514_p4), %vm1313_vm2, %v6049_v18  ;;  %5238 = vmatpush3.bf16.msra.mxu1 (!%p4514_p4), %v5235_v9  ;;  %v5227_v21 = vpack.c.bf16 (!%p4514_p4), %v1303_v20, %v1302_v19  ;;  %v1304_v22 = vld [vmem:[%s5906_s1 + $0x20] sm:$0xff] (!%p4514_p4)  ;;  %vm6071_vm4 = vmpackc.low (!%p4514_p4), %vm1571_vm3, %vm1571_vm3  ;;  %v1484_v40 = vld [vmem:[%s5916_s6 + $0x8] sm:$0xff] (!%p4514_p4)  ;;  %s6584_s0 = sld [smem:[#allocation32_spill]] (!%p4514_p4)  ;;  %s6586_s18 = sld [smem:[#allocation33_spill]] (!%p4514_p4) }
 0x2a0   : > { %5224 = vmatprep.subr.bf16.mxu0 (!%p4514_p4), %v5223_v15  ;;  %5240 = vmatprep.subr.bf16.mxu1 (!%p4514_p4), %v5239_v14  ;;  %v5231_v25 = vpack.c.bf16 (!%p4514_p4), %v1305_v23, %v1304_v22  ;;  %v6059_v26 = vld [vmem:[#allocation2 + $0x8] sm:$0xff] (!%p4514_p4)  ;;  %v4518_v27 = vld [vmem:[%s5901_s20] ss:$0 sm:$0xff] (!%p4514_p4)  ;;  %v1485_v41 = vld [vmem:[%s5916_s6 + $0x10] sm:$0xff] (!%p4514_p4) }
 0x2a1   : > { %5226 = vmatpush3.bf16.msra.mxu0 (!%p4514_p4), %v5223_v15  ;;  %4951 = vmatprep.mubr.msk.f32.mxu0 (!%p4514_p4), %vm1313_vm2, %v6049_v18  ;;  %v4515_v29 = vld [vmem:[%s5896_s3] ss:$0 sm:$0xff] (!%p4514_p4)  ;;  %v1486_v43 = vld [vmem:[%s5916_s6 + $0x18] sm:$0xff] (!%p4514_p4)  ;;  %v1488_v46 = vld [vmem:[%s5916_s6 + $0x28] sm:$0xff] (!%p4514_p4) }
 0x2a2   : > { %5228 = vmatprep.subr.bf16.mxu0 (!%p4514_p4), %v5227_v21  ;;  %v1483_v39 = vld [vmem:[%s5916_s6] sm:$0xff] (!%p4514_p4)  ;;  %v5251_v44 = vpack.c.bf16 (!%p4514_p4), %v1486_v43, %v1485_v41  ;;  %v6099_v50 = vld [vmem:[%s6577_s16 + $0x8] sm:$0xff] (!%p4514_p4)  ;;  %v4540_v8 = vld [vmem:[%s5911_s21 + $0x30] sm:$0xff] (!%p4514_p4) }
 0x2a3   : > { %5242 = vmatpush3.bf16.msra.mxu1 %v5239_v14  ;;  %v5247_v42 = vpack.c.bf16 %v1484_v40, %v1483_v39  ;;  %v1487_v45 = vld [vmem:[%s5916_s6 + $0x20] sm:$0xff]  ;;  %v4541_v9 = vld [vmem:[%s5911_s21 + $0x38] sm:$0xff]  ;;  %v4530_v11 = vld [vmem:[%s5906_s1 + $0x30] sm:$0xff] }
 0x2a4   : > { %5244 = vmatprep.subr.bf16.mxu1 %v5243_v24  ;;  %v5255_v47 = vpack.c.bf16 %v1488_v46, %v1487_v45  ;;  %v6094_v48 = vld [vmem:[%s6577_s16] sm:$0xff]  ;;  %v5281_v10 = vpack.c.bf16 %v4541_v9, %v4540_v8  ;;  %v4531_v12 = vld [vmem:[%s5906_s1 + $0x38] sm:$0xff]  ;;  %v4533_v15 = vld [vmem:[%s5906_s1 + $0x48] sm:$0xff] }
 0x2a5   : > { %5230 = vmatpush3.bf16.msra.mxu0 %v5227_v21  ;;  %v4521_v3 = vld [vmem:[%s6578_s11] ss:$0 sm:$0xff]  ;;  %v5269_v13 = vpack.c.bf16 %v4531_v12, %v4530_v11  ;;  %v4534_v17 = vld [vmem:[%s5906_s1 + $0x50] sm:$0xff]  ;;  %v4535_v19 = vld [vmem:[%s5906_s1 + $0x58] sm:$0xff]  ;;  %s6585_s2 = scalar_lea.vmem %s6584_s0, %s5885_s26  ;;  %s6587_s13 = scalar_lea.vmem %s6586_s18, %s5885_s26 }
 0x2a6   : > { %5232 = vmatprep.subr.bf16.mxu0 %v5231_v25  ;;  %v4532_v14 = vld [vmem:[%s5906_s1 + $0x40] sm:$0xff]  ;;  %v4550_v20 = vld [vmem:[%s5916_s6 + $0x30] sm:$0xff]  ;;  %v5277_v21 = vpack.c.bf16 %v4535_v19, %v4534_v17  ;;  %v4551_v22 = vld [vmem:[%s5916_s6 + $0x38] sm:$0xff] }
 0x2a7   : > { %5246 = vmatpush3.bf16.msra.mxu1 %v5243_v24  ;;  %v5273_v16 = vpack.c.bf16 %v4533_v15, %v4532_v14  ;;  %v5293_v23 = vpack.c.bf16 %v4551_v22, %v4550_v20  ;;  %v4552_v24 = vld [vmem:[%s5916_s6 + $0x40] sm:$0xff]  ;;  %vm6134_vm8 = vmpackc.low %vm2234_vm6, %vm5677_vm7  ;;  %v4543_v41 = vld [vmem:[%s5911_s21 + $0x48] sm:$0xff] }
 0x2a8   : > { %v4542_v40 = vld [vmem:[%s5911_s21 + $0x40] sm:$0xff]  ;;  %v4544_v45 = vld [vmem:[%s5911_s21 + $0x50] sm:$0xff]  ;;  %v4545_v46 = vld [vmem:[%s5911_s21 + $0x58] sm:$0xff] }
 0x2a9   : > { %5234 = vmatpush3.bf16.msra.mxu0 %v5231_v25  ;;  %v4553_v25 = vld [vmem:[%s5916_s6 + $0x48] sm:$0xff]  ;;  %v4584_v22 = vld [vmem:[%s5911_s21 + $0x60] sm:$0xff] }
 0x2aa   : > { %4967 = vmatmul.mubr.msk.f32.vlgmr.msra.gmra.mrb[0].mxu1 %vm1313_vm2, %v6059_v26  ;;  %5248 = vmatprep.subr.bf16.mxu0 %v5247_v42 }
 0x2ac   : > { %4952 = vmatmul.mubr.msk.f32.vlgmr.msra.gmra.mrb[0].mxu0 %vm1313_vm2, %v6059_v26 }
 0x2ad   : > { %4981 = vmatprep.mubr.msk.f32.mxu0 %vm1313_vm2, %v6049_v18  ;;  %5250 = vmatpush3.bf16.msra.mxu0 %v5247_v42 }
 0x2ae   : > { %5252 = vmatprep.subr.bf16.mxu0 %v5251_v44 }
 0x2b1   : > { %5254 = vmatpush3.bf16.msra.mxu0 %v5251_v44  ;;  %v5285_v44 = vpack.c.bf16 %v4543_v41, %v4542_v40 }
 0x2b2   : > { %5256 = vmatprep.subr.bf16.mxu0 %v5255_v47 }
 0x2b5   : > { %5258 = vmatpush3.bf16.msra.mxu0 %v5255_v47  ;;  %v5289_v47 = vpack.c.bf16 %v4545_v46, %v4544_v45  ;;  %v4576_v46 = vld [vmem:[%s5906_s1 + $0x70] sm:$0xff] }
 0x2b6   : > { %5270 = vmatprep.subr.bf16.mxu0 %v5269_v13 }
 0x2b8   : > { %4982 = vmatmul.mubr.msk.f32.vlgmr.msra.gmra.mrb[2].mxu0 %vm1313_vm2, %v6059_v26 }
 0x2b9   : > { %5010 = vmatprep.mubr.msk.f32.mxu0 %vm1313_vm2, %v6049_v18  ;;  %5272 = vmatpush3.bf16.msra.mxu0 %v5269_v13 }
 0x2ba   : > { %5274 = vmatprep.subr.bf16.mxu0 %v5273_v16 }
 0x2bd   : > { %5276 = vmatpush3.bf16.msra.mxu0 %v5273_v16  ;;  %v4557_v16 = vld [vmem:[%s6578_s11 + $0x1] ss:$0 sm:$0xff] }
 0x2be   : > { %5278 = vmatprep.subr.bf16.mxu0 %v5277_v21 }
 0x2c1   : > { %5280 = vmatpush3.bf16.msra.mxu0 %v5277_v21 }
 0x2c2   : > { %5294 = vmatprep.subr.bf16.mxu0 %v5293_v23 }
 0x2c4   : > { %5011 = vmatmul.mubr.msk.f32.vlgmr.msra.gmra.mrb[4].mxu0 %vm1313_vm2, %v6059_v26 }
 0x2c5   : > { %5296 = vmatpush3.bf16.msra.mxu0 %v5293_v23  ;;  %5040 = vmatprep.mubr.msk.f32.mxu0 %vm1313_vm2, %v6049_v18  ;;  %v4585_v23 = vld [vmem:[%s5911_s21 + $0x68] sm:$0xff] }
 0x37d   : > { %v4968_v28 = vpop.f32.mrb[0].mxu1 }
 0x37e   : > { %v1480_v30 = vadd.f32 %v4968_v28, %v4518_v27  ;;  %v1474_v31 = vpop.f32.mrb[1].mxu1  ;;  %v4554_v28 = vld [vmem:[%s5916_s6 + $0x50] sm:$0xff] }
 0x37f   : > { %v4953_v32 = vpop.f32.mrb[0].mxu0  ;;  %v1475_v33 = vadd.f32 %v4518_v27, %v1474_v31  ;;  %v5297_v27 = vpack.c.bf16 %v4553_v25, %v4552_v24  ;;  %v1763_v31 = vld [vmem:[%s6579_s5] sm:$0xff]  ;;  %v4586_v24 = vld [vmem:[%s5911_s21 + $0x70] sm:$0xff]  ;;  %v5339_v25 = vpack.c.bf16 %v4585_v23, %v4584_v22 }
 0x380   : > { %v1386_v34 = vpop.f32.mrb[1].mxu0  ;;  %v1392_v38 = vadd.f32 %v4953_v32, %v4515_v29  ;;  %v1764_v32 = vld [vmem:[%s6579_s5 + $0x8] sm:$0xf] }
 0x381   : > { %v1387_v36 = vadd.f32 %v4515_v29, %v1386_v34  ;;  %v5259_v37 = vpack.c.bf16 %v1480_v30, %v1475_v33  ;;  %v4555_v29 = vld [vmem:[%s5916_s6 + $0x58] sm:$0xff]  ;;  %5298 = vmatprep.subr.bf16.mxu0 %v5297_v27  ;;  %v5321_v33 = vpack.c.bf16 %v1764_v32, %v1763_v31  ;;  %v4588_v32 = vld [vmem:[%s5911_s21 + $0x80] sm:$0xff] }
 0x382   : > { %v5301_v30 = vpack.c.bf16 %v4555_v29, %v4554_v28  ;;  %5300 = vmatpush3.bf16.msra.mxu0 %v5297_v27  ;;  %v4587_v27 = vld [vmem:[%s5911_s21 + $0x78] sm:$0xff]  ;;  %v4566_v28 = vld [vmem:[%s6579_s5 + $0x10] sm:$0xff] }
 0x383   : > { %4988 = vmatprep.mubr.msk.f32.mxu1 %vm1571_vm3, %v1387_v36  ;;  %5261 = vmatprep.subr.msk.bf16.mxu1 %vm6071_vm4, %v5259_v37  ;;  %v4567_v29 = vld [vmem:[%s6579_s5 + $0x18] sm:$0xf] }
 0x384   : > { %5264 = vmatpush3.bf16.xpose.msk.msra.mxu1 %vm6071_vm4, %v5259_v37  ;;  %5302 = vmatprep.subr.bf16.mxu0 %v5301_v30  ;;  %v5315_v31 = vpack.c.bf16 %v4567_v29, %v4566_v28 }
 0x386   : > { %5304 = vmatpush3.bf16.msra.mxu0 %v5301_v30  ;;  %v5343_v30 = vpack.c.bf16 %v4587_v27, %v4586_v24 }
 0x387   : > { %5323 = vmatprep.subr.msk.bf16.mxu0 %vm6134_vm8, %v5321_v33 }
 0x389   : > { %5041 = vmatmul.mubr.msk.f32.vlgmr.msra.gmra.mrb[6].mxu0 %vm1313_vm2, %v6059_v26 }
 0x38a   : > { %5326 = vmatpush3.bf16.msk.msra.mxu0 %vm6134_vm8, %v5321_v33  ;;  %v4589_v33 = vld [vmem:[%s5911_s21 + $0x88] sm:$0xff] }
 0x38b   : > { %4989 = vmatmul.mubr.msk.f32.vlgmr.msra.gmra.mrb[2].mxu1 %vm1571_vm3, %v1392_v38  ;;  %v4983_v2 = vpop.f32.mrb[2].mxu0  ;;  %5340 = vmatprep.subr.bf16.mxu0 %v5339_v25 }
 0x38c   : > { %v1562_v4 = vpop.f32.mrb[3].mxu0  ;;  %v1568_v5 = vadd.f32 %v4983_v2, %v4521_v3 }
 0x38d   : > { %v1563_v6 = vadd.f32 %v4521_v3, %v1562_v4 }
 0x38f   : > { %v5265_v7 = vpack.c.bf16 %v1568_v5, %v1563_v6 }
 0x391   : > { %5266 = vmatprep.subr.bf16.mxu1 %v5265_v7 }
 0x392   : > { %5268 = vmatpush3.bf16.msra.mxu1 %v5265_v7 }
 0x393   : > { %5282 = vmatprep.subr.bf16.mxu1 %v5281_v10 }
 0x45e   : > { %v4990_v49 = vpop.f32.mrb[2].mxu1 }
 0x45f   : > { %v1650_v51 = vpop.f32.mrb[3].mxu1  ;;  %v1656_v53 = vadd.f32 %v4990_v49, %v6099_v50  ;;  %v4537_v49 = vld [vmem:[%s5896_s3 + $0x1] ss:$0 sm:$0xff] }
 0x460   : > { %v1651_v52 = vadd.f32 %v1650_v51, %v6094_v48  ;;  %v5012_v51 = vpop.f32.mrb[4].mxu0 }
 0x461   : > { %v1663_v55 = vsel %vm1659_vm5, %v1656_v53, -inf }
 0x462   : > { %v1660_v54 = vsel %vm1659_vm5, %v1651_v52, -inf }
 0x463   : > { %1661 = vmax.xlane.f32.xlu0 %v1660_v54 }
 0x467   : > { %1664 = vmax.xlane.f32.xlu0 %v1663_v55 }
 0x4f0   : > { %v1662_v56 = vpop.xlane.xlu0 %1661 }
 0x4f1   : > { %v1666_v57 = vsub.f32 %v1651_v52, %v1662_v56  ;;  %v1852_v52 = vadd.f32 %v5012_v51, %v4537_v49 }
 0x4f3   : > { %v1668_v58 = vmul.f32 1.442695, %v1666_v57  ;;  %v4547_v57 = vld [vmem:[%s5901_s20 + $0x1] ss:$0 sm:$0xff] }
 0x4f4   : > { %v1665_v59 = vpop.xlane.xlu0 %1664 }
 0x4f5   : > { %5506 = vpow2.f32 %v1668_v58  ;;  %v1667_v60 = vsub.f32 %v1656_v53, %v1665_v59  ;;  %v1846_v53 = vpop.f32.mrb[5].mxu0 }
 0x4f6   : > { %v1847_v54 = vadd.f32 %v4537_v49, %v1846_v53  ;;  %v5042_v15 = vpop.f32.mrb[6].mxu0  ;;  %v4578_v53 = vld [vmem:[%s5906_s1 + $0x80] sm:$0xff] }
 0x4f7   : > { %v1670_v61 = vmul.f32 1.442695, %v1667_v60  ;;  %v2026_v17 = vpop.f32.mrb[7].mxu0  ;;  %v2032_v19 = vadd.f32 %v5042_v15, %v4557_v16 }
 0x4f8   : > { %v2027_v20 = vadd.f32 %v4557_v16, %v2026_v17 }
 0x4f9   : > { %5508 = vpow2.f32 %v1670_v61 }
 0x4fa   : > { %v5311_v21 = vpack.c.bf16 %v2032_v19, %v2027_v20 }
 0x4ff   : > { %v6105_v62 = vpop.eup %5506 }
 0x500   : > { %v1672_v63 = vsel %vm1659_vm5, %v6105_v62, 0.0 }
 0x501   : > { %1673 = vadd.xlane.f32.xlu1 %v1672_v63 }
 0x503   : > { %v6109_v0 = vpop.eup %5508 }
 0x504   : > { %v1675_v1 = vsel %vm1659_vm5, %v6109_v0, 0.0 }
 0x505   : > { %1676 = vadd.xlane.f32.xlu1 %v1675_v1 }
 0x58e   : > { %v1674_v36 = vpop.xlane.xlu1 %1673 }
 0x58f   : > { %5510 = vrcp.f32 %v1674_v36  ;;  %v5347_v36 = vpack.c.bf16 %v4589_v33, %v4588_v32  ;;  %v4601_v33 = vld [vmem:[%s6578_s11 + $0x2] ss:$0 sm:$0xff] }
 0x592   : > { %v1677_v37 = vpop.xlane.xlu1 %1676 }
 0x593   : > { %5512 = vrcp.f32 %v1677_v37 }
 0x599   : > { %v5511_v38 = vpop.eup %5510 }
 0x59a   : > { %v1679_v39 = vmul.f32 %v5511_v38, %v6105_v62 }
 0x59c   : > { %4995 = vmatprep.mubr.msk.f32.mxu1 %vm1659_vm5, %v1679_v39 }
 0x59d   : > { %v5513_v42 = vpop.eup %5512 }
 0x59e   : > { %v1681_v43 = vmul.f32 %v5513_v42, %v6109_v0 }
 0x5a0   : > { %4996 = vmatmul.mubr.msk.f32.vlgmr.msra.gmra.mrb[4].mxu1 %vm1659_vm5, %v1681_v43  ;;  %v4574_v43 = vld [vmem:[%s5906_s1 + $0x60] sm:$0xff] }
 0x5a1   : > { %5284 = vmatpush3.bf16.msra.mxu1 %v5281_v10  ;;  %5025 = vmatprep.mubr.msk.f32.mxu1 %vm1313_vm2, %v6049_v18 }
 0x5a2   : > { %5286 = vmatprep.subr.bf16.mxu1 %v5285_v44 }
 0x5a5   : > { %5288 = vmatpush3.bf16.msra.mxu1 %v5285_v44  ;;  %v4575_v44 = vld [vmem:[%s5906_s1 + $0x68] sm:$0xff] }
 0x5a6   : > { %5290 = vmatprep.subr.bf16.mxu1 %v5289_v47  ;;  %v5327_v45 = vpack.c.bf16 %v4575_v44, %v4574_v43 }
 0x5a9   : > { %5292 = vmatpush3.bf16.msra.mxu1 %v5289_v47  ;;  %v4577_v47 = vld [vmem:[%s5906_s1 + $0x78] sm:$0xff] }
 0x5ac   : > { %5026 = vmatmul.mubr.msk.f32.vlgmr.msra.gmra.mrb[6].mxu1 %vm1313_vm2, %v6059_v26 }
 0x5ad   : > { %5047 = vmatprep.mubr.msk.f32.mxu1 %vm1571_vm3, %v1847_v54  ;;  %v4579_v54 = vld [vmem:[%s5906_s1 + $0x88] sm:$0xff] }
 0x673   : > { %v4997_v55 = vpop.f32.mrb[4].mxu1 }
 0x674   : > { %v1754_v56 = vpop.f32.mrb[5].mxu1 }
 0x675   : > { %5068 = vmatprep.mubr.msk.f32.mxu0 %vm1571_vm3, %v1754_v56 }
 0x676   : > { %5069 = vmatmul.mubr.msk.f32.vlgmr.msra.gmra.mrb[8].mxu0 %vm1571_vm3, %v4997_v55  ;;  %v5335_v55 = vpack.c.bf16 %v4579_v54, %v4578_v53  ;;  %v4615_v54 = vld [vmem:[%s5906_s1 + $0x90] sm:$0xff] }
 0x677   : > { %5098 = vmatprep.mubr.msk.f32.mxu0 %vm1313_vm2, %v6049_v18  ;;  %5342 = vmatpush3.bf16.msra.mxu0 %v5339_v25 }
 0x678   : > { %5344 = vmatprep.subr.bf16.mxu0 %v5343_v30 }
 0x67b   : > { %5346 = vmatpush3.bf16.msra.mxu0 %v5343_v30 }
 0x67c   : > { %5348 = vmatprep.subr.bf16.mxu0 %v5347_v36 }
 0x67f   : > { %v5027_v58 = vpop.f32.mrb[6].mxu1  ;;  %5350 = vmatpush3.bf16.msra.mxu0 %v5347_v36 }
 0x680   : > { %v1942_v59 = vadd.f32 %v5027_v58, %v4547_v57  ;;  %v1936_v60 = vpop.f32.mrb[7].mxu1 }
 0x681   : > { %v1937_v61 = vadd.f32 %v4547_v57, %v1936_v60  ;;  %v4591_v57 = vld [vmem:[%s5901_s20 + $0x2] ss:$0 sm:$0xff] }
 0x682   : > { %5099 = vmatmul.mubr.msk.f32.vlgmr.msra.gmra.mrb[10].mxu0 %vm1313_vm2, %v6059_v26 }
 0x683   : > { %v5305_v62 = vpack.c.bf16 %v1942_v59, %v1937_v61 }
 0x685   : > { %5307 = vmatprep.subr.msk.bf16.mxu1 %vm6071_vm4, %v5305_v62 }
 0x686   : > { %5310 = vmatpush3.bf16.xpose.msk.msra.mxu1 %vm6071_vm4, %v5305_v62 }
 0x687   : > { %5312 = vmatprep.subr.bf16.mxu1 %v5311_v21 }
 0x68d   : > { %5048 = vmatmul.mubr.msk.f32.vlgmr.msra.gmra.mrb[8].mxu1 %vm1571_vm3, %v1852_v52  ;;  %v5331_v52 = vpack.c.bf16 %v4577_v47, %v4576_v46 }
 0x68e   : > { %5314 = vmatpush3.bf16.msra.mxu1 %v5311_v21 }
 0x68f   : > { %5317 = vmatprep.subr.msk.bf16.mxu1 %vm6134_vm8, %v5315_v31 }
 0x755   : > { %v5100_v56 = vpop.f32.mrb[10].mxu0 }
 0x756   : > { %v2574_v58 = vadd.f32 %v5100_v56, %v4591_v57  ;;  %v2568_v59 = vpop.f32.mrb[11].mxu0 }
 0x757   : > { %v2569_v60 = vadd.f32 %v4591_v57, %v2568_v59  ;;  %v4617_v57 = vld [vmem:[%s5906_s1 + $0xa0] sm:$0xff] }
 0x759   : > { %v5363_v61 = vpack.c.bf16 %v2574_v58, %v2569_v60  ;;  %v4618_v58 = vld [vmem:[%s5906_s1 + $0xa8] sm:$0xff]  ;;  %v4619_v60 = vld [vmem:[%s5906_s1 + $0xb0] sm:$0xff] }
 0x75a   : > { %v5383_v59 = vpack.c.bf16 %v4618_v58, %v4617_v57 }
 0x75b   : > { %5365 = vmatprep.subr.msk.bf16.mxu0 %vm6071_vm4, %v5363_v61 }
 0x75c   : > { %5368 = vmatpush3.bf16.xpose.msk.msra.mxu0 %vm6071_vm4, %v5363_v61  ;;  %v4620_v61 = vld [vmem:[%s5906_s1 + $0xb8] sm:$0xff] }
 0x760   : > { %v5049_v63 = vpop.f32.mrb[8].mxu1 }
 0x761   : > { %v2119_v0 = vadd.f32 %v5049_v63, %v6099_v50  ;;  %v2113_v1 = vpop.f32.mrb[9].mxu1 }
 0x762   : > { %v2114_v2 = vadd.f32 %v2113_v1, %v6094_v48 }
 0x763   : > { %v2125_v3 = vsel %vm1659_vm5, %v2119_v0, -inf }
 0x764   : > { %2126 = vmax.xlane.f32.xlu1 %v2125_v3  ;;  %v2122_v4 = vsel %vm1659_vm5, %v2114_v2, -inf }
 0x765   : > { %2123 = vmax.xlane.f32.xlu0 %v2122_v4 }
 0x7f1   : > { %v2127_v5 = vpop.xlane.xlu1 %2126 }
 0x7f2   : > { %v2129_v6 = vsub.f32 %v2119_v0, %v2127_v5  ;;  %v2124_v7 = vpop.xlane.xlu0 %2123  ;;  %v4581_v0 = vld [vmem:[%s5896_s3 + $0x2] ss:$0 sm:$0xff] }
 0x7f3   : > { %v2128_v8 = vsub.f32 %v2114_v2, %v2124_v7  ;;  %v4594_v5 = vld [vmem:[%s5916_s6 + $0x60] sm:$0xff]  ;;  %v4596_v7 = vld [vmem:[%s5916_s6 + $0x70] sm:$0xff] }
 0x7f4   : > { %v2132_v9 = vmul.f32 1.442695, %v2129_v6  ;;  %v4595_v6 = vld [vmem:[%s5916_s6 + $0x68] sm:$0xff] }
 0x7f5   : > { %v2130_v10 = vmul.f32 1.442695, %v2128_v8  ;;  %v5351_v8 = vpack.c.bf16 %v4595_v6, %v4594_v5  ;;  %v4629_v6 = vld [vmem:[%s5911_s21 + $0xb0] sm:$0xff] }
 0x7f6   : > { %5514 = vpow2.f32 %v2132_v9  ;;  %v4597_v9 = vld [vmem:[%s5916_s6 + $0x78] sm:$0xff] }
 0x7f7   : > { %5516 = vpow2.f32 %v2130_v10  ;;  %v5355_v10 = vpack.c.bf16 %v4597_v9, %v4596_v7  ;;  %v4630_v7 = vld [vmem:[%s5911_s21 + $0xb8] sm:$0xff]  ;;  %v4622_v9 = vld [vmem:[%s5896_s3 + $0x3] ss:$0 sm:$0xff]  ;;  %s6582_s3 = sld [smem:[#allocation31_spill]] }
 0x800   : > { %v5515_v11 = vpop.eup %5514 }
 0x801   : > { %v5517_v12 = vpop.eup %5516  ;;  %v2137_v13 = vsel %vm1659_vm5, %v5515_v11, 0.0 }
 0x802   : > { %2138 = vadd.xlane.f32.xlu1 %v2137_v13  ;;  %v2134_v14 = vsel %vm1659_vm5, %v5517_v12, 0.0 }
 0x803   : > { %2135 = vadd.xlane.f32.xlu0 %v2134_v14 }
 0x88f   : > { %v2139_v37 = vpop.xlane.xlu1 %2138 }
 0x890   : > { %5518 = vrcp.f32 %v2139_v37  ;;  %v2136_v38 = vpop.xlane.xlu0 %2135 }
 0x891   : > { %5520 = vrcp.f32 %v2136_v38 }
 0x89a   : > { %v5519_v39 = vpop.eup %5518 }
 0x89b   : > { %v5521_v40 = vpop.eup %5520  ;;  %v2143_v42 = vmul.f32 %v5519_v39, %v5515_v11  ;;  %v4598_v11 = vld [vmem:[%s5916_s6 + $0x80] sm:$0xff] }
 0x89c   : > { %v2141_v41 = vmul.f32 %v5521_v40, %v5517_v12  ;;  %v4599_v12 = vld [vmem:[%s5916_s6 + $0x88] sm:$0xff]  ;;  %v4610_v40 = vld [vmem:[%s6579_s5 + $0x20] sm:$0xff] }
 0x89d   : > { %v5359_v13 = vpack.c.bf16 %v4599_v12, %v4598_v11 }
 0x89e   : > { %5054 = vmatprep.mubr.msk.f32.mxu1 %vm1659_vm5, %v2141_v41  ;;  %v4611_v41 = vld [vmem:[%s6579_s5 + $0x28] sm:$0xf] }
 0x89f   : > { %5055 = vmatmul.mubr.msk.f32.vlgmr.msra.gmra.mrb[10].mxu1 %vm1659_vm5, %v2143_v42  ;;  %v5373_v42 = vpack.c.bf16 %v4611_v41, %v4610_v40 }
 0x8a0   : > { %5320 = vmatpush3.bf16.msk.msra.mxu1 %vm6134_vm8, %v5315_v31 }
 0x8a1   : > { %5328 = vmatprep.subr.bf16.mxu1 %v5327_v45  ;;  %5375 = vmatprep.subr.msk.bf16.mxu0 %vm6134_vm8, %v5373_v42 }
 0x972   : > { %v5056_v49 = vpop.f32.mrb[10].mxu1 }
 0x973   : > { %v2216_v51 = vpop.f32.mrb[11].mxu1 }
 0x974   : > { %5061 = vmatprep.mubr.msk.f32.mxu1 %vm1571_vm3, %v2216_v51  ;;  %v4625_v51 = vld [vmem:[%s5911_s21 + $0x90] sm:$0xff] }
 0x975   : > { %5062 = vmatmul.mubr.msk.f32.vlgmr.msra.gmra.mrb[12].mxu1 %vm1571_vm3, %v5056_v49 }
 0x976   : > { %5330 = vmatpush3.bf16.msra.mxu1 %v5327_v45  ;;  %5083 = vmatprep.mubr.msk.f32.mxu1 %vm1313_vm2, %v6049_v18 }
 0x977   : > { %5332 = vmatprep.subr.bf16.mxu1 %v5331_v52 }
 0x97a   : > { %5334 = vmatpush3.bf16.msra.mxu1 %v5331_v52  ;;  %v4626_v52 = vld [vmem:[%s5911_s21 + $0x98] sm:$0xff] }
 0x97b   : > { %5336 = vmatprep.subr.bf16.mxu1 %v5335_v55  ;;  %v5391_v53 = vpack.c.bf16 %v4626_v52, %v4625_v51 }
 0x97e   : > { %5338 = vmatpush3.bf16.msra.mxu1 %v5335_v55  ;;  %v4616_v55 = vld [vmem:[%s5906_s1 + $0x98] sm:$0xff] }
 0x97f   : > { %5352 = vmatprep.subr.bf16.mxu1 %v5351_v8  ;;  %v5379_v56 = vpack.c.bf16 %v4616_v55, %v4615_v54  ;;  %v4651_v54 = vld [vmem:[%s6579_s5 + $0x30] sm:$0xff]  ;;  %v4652_v55 = vld [vmem:[%s6579_s5 + $0x38] sm:$0xf] }
 0x981   : > { %5084 = vmatmul.mubr.msk.f32.vlgmr.msra.gmra.mrb[14].mxu1 %vm1313_vm2, %v6059_v26 }
 0x982   : > { %5113 = vmatprep.mubr.msk.f32.mxu1 %vm1313_vm2, %v6049_v18  ;;  %5354 = vmatpush3.bf16.msra.mxu1 %v5351_v8  ;;  %v5399_v8 = vpack.c.bf16 %v4630_v7, %v4629_v6 }
 0x983   : > { %5356 = vmatprep.subr.bf16.mxu1 %v5355_v10 }
 0x986   : > { %5358 = vmatpush3.bf16.msra.mxu1 %v5355_v10 }
 0x987   : > { %5360 = vmatprep.subr.bf16.mxu1 %v5359_v13 }
 0x98a   : > { %5362 = vmatpush3.bf16.msra.mxu1 %v5359_v13 }
 0x98d   : > { %5114 = vmatmul.mubr.msk.f32.vlgmr.msra.gmra.mrb[16].mxu1 %vm1313_vm2, %v6059_v26 }
 0xa48   : > { %v6210_v62 = vpop.f32.mrb[12].mxu1 }
 0xa49   : > { %v6212_v63 = vpop.f32.mrb[13].mxu1 }
 0xa54   : > { %v5085_v1 = vpop.f32.mrb[14].mxu1 }
 0xa55   : > { %v2478_v2 = vpop.f32.mrb[15].mxu1  ;;  %v2484_v4 = vadd.f32 %v5085_v1, %v4581_v0  ;;  %v4627_v1 = vld [vmem:[%s5911_s21 + $0xa0] sm:$0xff] }
 0xa56   : > { %v2479_v3 = vadd.f32 %v4581_v0, %v2478_v2  ;;  %v5387_v0 = vpack.c.bf16 %v4620_v61, %v4619_v60  ;;  %v4628_v2 = vld [vmem:[%s5911_s21 + $0xa8] sm:$0xff] }
 0xa57   : > { %v5395_v5 = vpack.c.bf16 %v4628_v2, %v4627_v1 }
 0xa58   : > { %5120 = vmatprep.mubr.msk.f32.mxu0 %vm1571_vm3, %v2479_v3 }
 0xa59   : > { %5121 = vmatmul.mubr.msk.f32.vlgmr.msra.gmra.mrb[12].mxu0 %vm1571_vm3, %v2484_v4 }
 0xa5a   : > { %5378 = vmatpush3.bf16.msk.msra.mxu0 %vm6134_vm8, %v5373_v42 }
 0xa5b   : > { %5392 = vmatprep.subr.bf16.mxu0 %v5391_v53 }
 0xa60   : > { %v5115_v32 = vpop.f32.mrb[16].mxu1 }
 0xa61   : > { %v2658_v36 = vpop.f32.mrb[17].mxu1  ;;  %v2664_v37 = vadd.f32 %v5115_v32, %v4601_v33 }
 0xa62   : > { %v2659_v38 = vadd.f32 %v4601_v33, %v2658_v36 }
 0xa64   : > { %v5369_v39 = vpack.c.bf16 %v2664_v37, %v2659_v38 }
 0xa66   : > { %5370 = vmatprep.subr.bf16.mxu1 %v5369_v39 }
 0xa67   : > { %5372 = vmatpush3.bf16.msra.mxu1 %v5369_v39 }
 0xa68   : > { %5380 = vmatprep.subr.bf16.mxu1 %v5379_v56 }
 0xb2c   : > { %v5122_v14 = vpop.f32.mrb[12].mxu0 }
 0xb2d   : > { %v2751_v15 = vadd.f32 %v5122_v14, %v6099_v50  ;;  %v2745_v16 = vpop.f32.mrb[13].mxu0  ;;  %v4632_v14 = vld [vmem:[%s5901_s20 + $0x3] ss:$0 sm:$0xff]  ;;  %s6583_s20 = scalar_lea.vmem %s6582_s3, %s5885_s26 }
 0xb2e   : > { %v2746_v17 = vadd.f32 %v2745_v16, %v6094_v48 }
 0xb2f   : > { %v2757_v19 = vsel %vm1659_vm5, %v2751_v15, -inf }
 0xb30   : > { %2758 = vmax.xlane.f32.xlu1 %v2757_v19  ;;  %v2754_v20 = vsel %vm1659_vm5, %v2746_v17, -inf }
 0xb31   : > { %2755 = vmax.xlane.f32.xlu0 %v2754_v20 }
 0xbbd   : > { %v2759_v21 = vpop.xlane.xlu1 %2758 }
 0xbbe   : > { %v2761_v22 = vsub.f32 %v2751_v15, %v2759_v21  ;;  %v2756_v23 = vpop.xlane.xlu0 %2755  ;;  %v4635_v21 = vld [vmem:[%s5916_s6 + $0x90] sm:$0xff] }
 0xbbf   : > { %v2760_v24 = vsub.f32 %v2746_v17, %v2756_v23  ;;  %v4637_v23 = vld [vmem:[%s5916_s6 + $0xa0] sm:$0xff] }
 0xbc0   : > { %v2764_v25 = vmul.f32 1.442695, %v2761_v22  ;;  %v4636_v22 = vld [vmem:[%s5916_s6 + $0x98] sm:$0xff] }
 0xbc1   : > { %v2762_v27 = vmul.f32 1.442695, %v2760_v24  ;;  %v5403_v24 = vpack.c.bf16 %v4636_v22, %v4635_v21 }
 0xbc2   : > { %5522 = vpow2.f32 %v2764_v25  ;;  %v4638_v25 = vld [vmem:[%s5916_s6 + $0xa8] sm:$0xff] }
 0xbc3   : > { %5524 = vpow2.f32 %v2762_v27  ;;  %v5407_v27 = vpack.c.bf16 %v4638_v25, %v4637_v23 }
 0xbcc   : > { %v5523_v28 = vpop.eup %5522 }
 0xbcd   : > { %v5525_v29 = vpop.eup %5524  ;;  %v2769_v30 = vsel %vm1659_vm5, %v5523_v28, 0.0 }
 0xbce   : > { %2770 = vadd.xlane.f32.xlu1 %v2769_v30  ;;  %v2766_v31 = vsel %vm1659_vm5, %v5525_v29, 0.0 }
 0xbcf   : > { %2767 = vadd.xlane.f32.xlu0 %v2766_v31 }
 0xc5b   : > { %v2771_v43 = vpop.xlane.xlu1 %2770 }
 0xc5c   : > { %5526 = vrcp.f32 %v2771_v43  ;;  %v2768_v44 = vpop.xlane.xlu0 %2767 }
 0xc5d   : > { %5528 = vrcp.f32 %v2768_v44 }
 0xc66   : > { %v5527_v45 = vpop.eup %5526 }
 0xc67   : > { %v5529_v46 = vpop.eup %5528  ;;  %v2775_v49 = vmul.f32 %v5527_v45, %v5523_v28  ;;  %v4639_v28 = vld [vmem:[%s5916_s6 + $0xb0] sm:$0xff] }
 0xc68   : > { %v2773_v47 = vmul.f32 %v5529_v46, %v5525_v29  ;;  %v4640_v29 = vld [vmem:[%s5916_s6 + $0xb8] sm:$0xff] }
 0xc69   : > { %v5411_v30 = vpack.c.bf16 %v4640_v29, %v4639_v28  ;;  %v4657_v28 = vld [vmem:[%s6585_s2] ss:$0 sm:$0xff] }
 0xc6a   : > { %5127 = vmatprep.mubr.msk.f32.mxu1 %vm1659_vm5, %v2773_v47  ;;  %v4642_v47 = vld [vmem:[%s6578_s11 + $0x3] ss:$0 sm:$0xff] }
 0xc6b   : > { %5128 = vmatmul.mubr.msk.f32.vlgmr.msra.gmra.mrb[18].mxu1 %vm1659_vm5, %v2775_v49 }
 0xc6c   : > { %5149 = vmatprep.mubr.msk.f32.mxu1 %vm1313_vm2, %v6049_v18  ;;  %5382 = vmatpush3.bf16.msra.mxu1 %v5379_v56  ;;  %v5425_v56 = vpack.c.bf16 %v4652_v55, %v4651_v54 }
 0xc6d   : > { %5384 = vmatprep.subr.bf16.mxu1 %v5383_v59 }
 0xc70   : > { %5386 = vmatpush3.bf16.msra.mxu1 %v5383_v59 }
 0xc71   : > { %5388 = vmatprep.subr.bf16.mxu1 %v5387_v0 }
 0xc74   : > { %5390 = vmatpush3.bf16.msra.mxu1 %v5387_v0 }
 0xc75   : > { %5404 = vmatprep.subr.bf16.mxu1 %v5403_v24 }
 0xc77   : > { %5150 = vmatmul.mubr.msk.f32.vlgmr.msra.gmra.mrb[20].mxu1 %vm1313_vm2, %v6059_v26 }
 0xc78   : > { %5179 = vmatprep.mubr.msk.f32.mxu1 %vm1313_vm2, %v6049_v18  ;;  %5406 = vmatpush3.bf16.msra.mxu1 %v5403_v24 }
 0xc79   : > { %5408 = vmatprep.subr.bf16.mxu1 %v5407_v27 }
 0xc7c   : > { %5410 = vmatpush3.bf16.msra.mxu1 %v5407_v27 }
 0xc7d   : > { %5412 = vmatprep.subr.bf16.mxu1 %v5411_v30 }
 0xc80   : > { %5414 = vmatpush3.bf16.msra.mxu1 %v5411_v30 }
 0xc83   : > { %5180 = vmatmul.mubr.msk.f32.vlgmr.msra.gmra.mrb[22].mxu1 %vm1313_vm2, %v6059_v26 }
 0xd3e   : > { %v5129_v3 = vpop.f32.mrb[18].mxu1 }
 0xd3f   : > { %v2848_v4 = vpop.f32.mrb[19].mxu1 }
 0xd40   : > { %5134 = vmatprep.mubr.msk.f32.mxu0 %vm1571_vm3, %v2848_v4  ;;  %v4656_v4 = vld [vmem:[%s6583_s20] ss:$0 sm:$0xff] }
 0xd41   : > { %5135 = vmatmul.mubr.msk.f32.vlgmr.msra.gmra.mrb[8].mxu0 %vm1571_vm3, %v5129_v3 }
 0xd42   : > { %5394 = vmatpush3.bf16.msra.mxu0 %v5391_v53  ;;  %5164 = vmatprep.mubr.msk.f32.mxu0 %vm1313_vm2, %v6049_v18 }
 0xd43   : > { %5396 = vmatprep.subr.bf16.mxu0 %v5395_v5 }
 0xd46   : > { %5398 = vmatpush3.bf16.msra.mxu0 %v5395_v5 }
 0xd47   : > { %5400 = vmatprep.subr.bf16.mxu0 %v5399_v8 }
 0xd4a   : > { %5402 = vmatpush3.bf16.msra.mxu0 %v5399_v8  ;;  %v5151_v10 = vpop.f32.mrb[20].mxu1 }
 0xd4b   : > { %v3033_v11 = vadd.f32 %v5151_v10, %v4622_v9  ;;  %v3027_v12 = vpop.f32.mrb[21].mxu1 }
 0xd4c   : > { %v3028_v13 = vadd.f32 %v4622_v9, %v3027_v12 }
 0xd4d   : > { %5165 = vmatmul.mubr.msk.f32.vlgmr.msra.gmra.mrb[14].mxu0 %vm1313_vm2, %v6059_v26 }
 0xd4e   : > { %5186 = vmatprep.mubr.msk.f32.mxu0 %vm1571_vm3, %v3028_v13 }
 0xd56   : > { %v5181_v46 = vpop.f32.mrb[22].mxu1 }
 0xd57   : > { %v3207_v49 = vpop.f32.mrb[23].mxu1  ;;  %v3213_v51 = vadd.f32 %v5181_v46, %v4642_v47 }
 0xd58   : > { %v3208_v52 = vadd.f32 %v4642_v47, %v3207_v49 }
 0xd5a   : > { %v5421_v53 = vpack.c.bf16 %v3213_v51, %v3208_v52 }
 0xe20   : > { %v5166_v15 = vpop.f32.mrb[14].mxu0 }
 0xe21   : > { %v3123_v16 = vadd.f32 %v5166_v15, %v4632_v14  ;;  %v3117_v17 = vpop.f32.mrb[15].mxu0 }
 0xe22   : > { %v3118_v19 = vadd.f32 %v4632_v14, %v3117_v17 }
 0xe24   : > { %v5415_v20 = vpack.c.bf16 %v3123_v16, %v3118_v19 }
 0xe26   : > { %5417 = vmatprep.subr.msk.bf16.mxu0 %vm6071_vm4, %v5415_v20 }
 0xe27   : > { %5420 = vmatpush3.bf16.xpose.msk.msra.mxu0 %vm6071_vm4, %v5415_v20 }
 0xe28   : > { %5422 = vmatprep.subr.bf16.mxu0 %v5421_v53 }
 0xe2e   : > { %5187 = vmatmul.mubr.msk.f32.vlgmr.msra.gmra.mrb[16].mxu0 %vm1571_vm3, %v3033_v11 }
 0xe2f   : > { %5424 = vmatpush3.bf16.msra.mxu0 %v5421_v53 }
 0xe30   : > { %5427 = vmatprep.subr.msk.bf16.mxu0 %vm6134_vm8, %v5425_v56 }
 0xf01   : > { %v5188_v35 = vpop.f32.mrb[16].mxu0 }
 0xf02   : > { %v3300_v31 = vadd.f32 %v5188_v35, %v6099_v50  ;;  %v3294_v32 = vpop.f32.mrb[17].mxu0  ;;  %v4658_v35 = vld [vmem:[%s6587_s13] ss:$0 sm:$0xff] }
 0xf03   : > { %v3295_v33 = vadd.f32 %v3294_v32, %v6094_v48 }
 0xf04   : > { %v3306_v36 = vsel %vm1659_vm5, %v3300_v31, -inf }
 0xf05   : > { %3307 = vmax.xlane.f32.xlu1 %v3306_v36  ;;  %v3303_v37 = vsel %vm1659_vm5, %v3295_v33, -inf }
 0xf06   : > { %3304 = vmax.xlane.f32.xlu0 %v3303_v37 }
 0xf92   : > { %v3308_v38 = vpop.xlane.xlu1 %3307 }
 0xf93   : > { %v3310_v39 = vsub.f32 %v3300_v31, %v3308_v38  ;;  %v3305_v40 = vpop.xlane.xlu0 %3304 }
 0xf94   : > { %v3309_v41 = vsub.f32 %v3295_v33, %v3305_v40 }
 0xf95   : > { %v3313_v42 = vmul.f32 1.442695, %v3310_v39 }
 0xf96   : > { %v3311_v43 = vmul.f32 1.442695, %v3309_v41 }
 0xf97   : > { %5530 = vpow2.f32 %v3313_v42 }
 0xf98   : > { %5532 = vpow2.f32 %v3311_v43 }
 0xfa1   : > { %v5531_v50 = vpop.eup %5530 }
 0xfa2   : > { %v5533_v44 = vpop.eup %5532  ;;  %v3318_v48 = vsel %vm1659_vm5, %v5531_v50, 0.0 }
 0xfa3   : > { %3319 = vadd.xlane.f32.xlu1 %v3318_v48  ;;  %v3315_v45 = vsel %vm1659_vm5, %v5533_v44, 0.0 }
 0xfa4   : > { %3316 = vadd.xlane.f32.xlu0 %v3315_v45 }
0x1030   : > { %v3320_v57 = vpop.xlane.xlu1 %3319 }
0x1031   : > { %5534 = vrcp.f32 %v3320_v57  ;;  %v3317_v58 = vpop.xlane.xlu0 %3316 }
0x1032   : > { %5536 = vrcp.f32 %v3317_v58 }
0x103b   : > { %v5535_v59 = vpop.eup %5534 }
0x103c   : > { %v5537_v60 = vpop.eup %5536  ;;  %v3324_v0 = vmul.f32 %v5535_v59, %v5531_v50 }
0x103d   : > { %v3322_v61 = vmul.f32 %v5537_v60, %v5533_v44 }
0x103f   : > { %5193 = vmatprep.mubr.msk.f32.mxu0 %vm1659_vm5, %v3322_v61 }
0x1040   : > { %5194 = vmatmul.mubr.msk.f32.vlgmr.msra.gmra.mrb[18].mxu0 %vm1659_vm5, %v3324_v0 }
0x1041   : > { %5430 = vmatpush3.bf16.msk.msra.mxu0 %vm6134_vm8, %v5425_v56 }
0x1113   : > { %v5195_v1 = vpop.f32.mrb[18].mxu0 }
0x1114   : > { %v3397_v2 = vpop.f32.mrb[19].mxu0 }
0x1115   : > { %5200 = vmatprep.mubr.msk.f32.mxu0 %vm1571_vm3, %v3397_v2 }
0x1116   : > { %5201 = vmatmul.mubr.msk.f32.vlgmr.msra.gmra.mrb[8].mxu0 %vm1571_vm3, %v5195_v1 }
0x11e9   : > { %v5202_v3 = vpop.f32.mrb[8].mxu0 }
0x11ea   : > { %v5431_v5 = vadd.f32 %v5202_v3, %v6210_v62  ;;  %v3484_v6 = vpop.f32.mrb[9].mxu0 }
0x11eb   : > { %v5432_v7 = vadd.f32 %v3484_v6, %v6212_v63 }
0x11ec   : > { %v3503_v8 = vadd.f32 %v5431_v5, %v4656_v4 }
0x11ed   : > { %v3502_v34 = vadd.f32 %v5432_v7, %v4656_v4 }
0x11ee   : > { %v3505_v9 = vadd.f32 %v3503_v8, %v6059_v26 }
0x11ef   : > { %v3504_v10 = vadd.f32 %v3502_v34, %v6049_v18 }
0x11f0   : > { %v3511_v11 = vsel %vm1313_vm2, %v3505_v9, 0.0 }
0x11f1   : > { %3512 = vadd.xlane.f32.xlu1 %v3511_v11  ;;  %v3508_v12 = vsel %vm1313_vm2, %v3504_v10, 0.0 }
0x11f2   : > { %3509 = vadd.xlane.f32.xlu0 %v3508_v12 }
0x127e   : > { %v3513_v13 = vpop.xlane.xlu1 %3512 }
0x127f   : > { %v3516_v14 = vmul.f32 0.020833334, %v3513_v13  ;;  %v3510_v15 = vpop.xlane.xlu0 %3509 }
0x1280   : > { %v3515_v16 = vmul.f32 0.020833334, %v3510_v15 }
0x1281   : > { %v3518_v62 = vsub.f32 %v3505_v9, %v3516_v14 }
0x1282   : > { %v3517_v17 = vsub.f32 %v3504_v10, %v3515_v16 }
0x1283   : > { %v3520_v63 = vmul.f32 %v3518_v62, %v3518_v62 }
0x1284   : > { %v3519_v19 = vmul.f32 %v3517_v17, %v3517_v17 }
0x1285   : > { %v3524_v20 = vsel %vm1313_vm2, %v3520_v63, 0.0 }
0x1286   : > { %3525 = vadd.xlane.f32.xlu1 %v3524_v20  ;;  %v3521_v18 = vsel %vm1313_vm2, %v3519_v19, 0.0 }
0x1287   : > { %3522 = vadd.xlane.f32.xlu0 %v3521_v18 }
0x1313   : > { %v3526_v26 = vpop.xlane.xlu1 %3525 }
0x1314   : > { %v3528_v21 = vmul.f32 0.020833334, %v3526_v26  ;;  %v3523_v22 = vpop.xlane.xlu0 %3522 }
0x1315   : > { %v3527_v23 = vmul.f32 0.020833334, %v3523_v22 }
0x1316   : > { %v3530_v24 = vadd.f32 1e-12, %v3528_v21 }
0x1317   : > { %v3529_v25 = vadd.f32 1e-12, %v3527_v23 }
0x1318   : > { %5538 = vrsqrt.f32 %v3530_v24 }
0x1319   : > { %5540 = vrsqrt.f32 %v3529_v25 }
0x1322   : > { %v5539_v27 = vpop.eup %5538 }
0x1323   : > { %v5541_v29 = vpop.eup %5540  ;;  %v3534_v30 = vmul.f32 %v5539_v27, %v3518_v62 }
0x1324   : > { %v3533_v31 = vmul.f32 %v5541_v29, %v3517_v17 }
0x1325   : > { %v3542_v32 = vmul.f32 %v4657_v28, %v3534_v30 }
0x1326   : > { %v3541_v33 = vmul.f32 %v4657_v28, %v3533_v31 }
0x1327   : > { %v3550_v36 = vadd.f32 %v4658_v35, %v3542_v32 }
0x1328   : > { %v3549_v37 = vadd.f32 %v4658_v35, %v3541_v33 }
0x1329   : > { %3552 = vst.msk [vmem:[#allocation3 + $0x8] sm:$0xff] %vm1313_vm2, %v3550_v36 }
0x132a   : > { %3551 = vst.msk [vmem:[#allocation3] sm:$0xff] %vm1313_vm2, %v3549_v37 }
0x132b PF: > { %v5542_v38 = vld [vmem:[%s5974_s10 + $0x4] ss:$16 sps:$4 sm:$0xff]   ;;  %v5544_v39 = vld [vmem:[%s5974_s10 + $0xc] ss:$16 sps:$4 sm:$0xff]   ;;  %v5678_v40 = vmov 0   ;;  %vm3652_vm9 = vcmask 392192   ;;  %v3572_v26 = vlaneseq }
0x132c   : > { %3688 = vmatprep.mubr.bf16.mxu0 %v5678_v40  ;;  %3731 = vmatprep.mubr.bf16.mxu1 %v5678_v40  ;;  %v5546_v41 = vld [vmem:[%s5974_s10] ss:$16 sps:$4 sm:$0xff]   ;;  %v5547_v42 = vld [vmem:[%s5974_s10 + $0x8] ss:$16 sps:$4 sm:$0xff]   ;;  %v5548_v43 = vld [vmem:[%s5974_s10 + $0x24] ss:$16 sps:$4 sm:$0xff]  }
0x132d   : > { %3656 = vmatprep.subr.bf16.mxu0 %v5542_v38  ;;  %3699 = vmatprep.subr.bf16.mxu1 %v5544_v39  ;;  %v5550_v50 = vld [vmem:[%s5974_s10 + $0x2c] ss:$16 sps:$4 sm:$0xff]   ;;  %v5552_v44 = vld [vmem:[%s5974_s10 + $0x20] ss:$16 sps:$4 sm:$0xff]   ;;  %v5553_v48 = vld [vmem:[%s5974_s10 + $0x28] ss:$16 sps:$4 sm:$0xff]  }
0x132e   : > { %3657 = vmatpush1.bf16.msra.mxu0 %v5546_v41  ;;  %3700 = vmatpush1.bf16.msra.mxu1 %v5547_v42  ;;  %v5554_v45 = vld [vmem:[%s5974_s10 + $0x44] ss:$16 sps:$4 sm:$0xff]   ;;  %v5556_v46 = vld [vmem:[%s5974_s10 + $0x4c] ss:$16 sps:$4 sm:$0xff]   ;;  %v5558_v47 = vld [vmem:[%s5974_s10 + $0x40] ss:$16 sps:$4 sm:$0xff]  }
0x132f   : > { %3658 = vmatprep.subr.bf16.mxu0 %v5548_v43  ;;  %3701 = vmatprep.subr.bf16.mxu1 %v5550_v50  ;;  %v5559_v49 = vld [vmem:[%s5974_s10 + $0x48] ss:$16 sps:$4 sm:$0xff]   ;;  %v5560_v54 = vld [vmem:[%s5969_s19 + $0x40] sm:$0xff]   ;;  %v5568_v0 = vld [vmem:[%s5969_s19 + $0x50] sm:$0xff]   ;;  %v3573_v21 = vshrl.u32 %v3572_v26, 7  ;;  %p4705_p5 = scmp.ne.s32.totalorder %s5658_s8, 5 }
0x1330   : > { %v3556_v52 = vld [vmem:[#allocation3 + $0x8] sm:$0xff]  ;;  %v5561_v55 = vld [vmem:[%s5969_s19 + $0xc0] sm:$0xff]   ;;  %v5564_v58 = vld [vmem:[%s5969_s19 + $0x48] sm:$0xff]  }
0x1331   : > { %v3555_v51 = vld [vmem:[#allocation3] sm:$0xff]  ;;  %v5562_v56 = vld [vmem:[%s5969_s19] sm:$0xff]   ;;  %v5565_v59 = vld [vmem:[%s5969_s19 + $0xc8] sm:$0xff]   ;;  %v3574_v22 = vsub.s32 0, %v3573_v21  ;;  %v3582_v23 = vsub.s32 2, %v3573_v21  ;;  %v3578_v25 = vsub.s32 1, %v3573_v21 }
0x1332   : > { %3659 = vmatpush1.bf16.msra.mxu0 %v5552_v44  ;;  %3702 = vmatpush1.bf16.msra.mxu1 %v5553_v48  ;;  %v3557_v53 = vpack.c.bf16 %v3556_v52, %v3555_v51  ;;  %v5563_v57 = vld [vmem:[%s5969_s19 + $0x80] sm:$0xff]   ;;  %v5566_v60 = vld [vmem:[%s5969_s19 + $0x8] sm:$0xff]   ;;  %v5569_v1 = vld [vmem:[%s5969_s19 + $0xd0] sm:$0xff]   ;;  %v3586_v27 = vsub.s32 3, %v3573_v21 }
0x1333   : > { %3660 = vmatprep.subr.bf16.mxu0 %v5554_v45  ;;  %3703 = vmatprep.subr.bf16.mxu1 %v5556_v46  ;;  %v5567_v61 = vld [vmem:[%s5969_s19 + $0x88] sm:$0xff]   ;;  %v5570_v2 = vld [vmem:[%s5969_s19 + $0x10] sm:$0xff]   ;;  %v5572_v4 = vld [vmem:[%s5969_s19 + $0x58] sm:$0xff]  }
0x1334   : > { %v5571_v3 = vld [vmem:[%s5969_s19 + $0x90] sm:$0xff]   ;;  %v5573_v5 = vld [vmem:[%s5969_s19 + $0xd8] sm:$0xff]   ;;  %v5576_v8 = vld [vmem:[%s5969_s19 + $0x60] sm:$0xff]  }
0x1335   : > { %v5574_v6 = vld [vmem:[%s5969_s19 + $0x18] sm:$0xff]   ;;  %v5577_v34 = vld [vmem:[%s5969_s19 + $0xe0] sm:$0xff]   ;;  %v5580_v11 = vld [vmem:[%s5969_s19 + $0x68] sm:$0xff]  }
0x1336   : > { %3661 = vmatpush1.bf16.msra.mxu0 %v5558_v47  ;;  %3704 = vmatpush1.bf16.msra.mxu1 %v5559_v49  ;;  %v5575_v7 = vld [vmem:[%s5969_s19 + $0x98] sm:$0xff]   ;;  %v5578_v9 = vld [vmem:[%s5969_s19 + $0x20] sm:$0xff]   ;;  %v5581_v12 = vld [vmem:[%s5969_s19 + $0xe8] sm:$0xff]  }
0x1337   : > { %4872 = vmatprep.subr.bf16.mxu0 %v5560_v54  ;;  %4894 = vmatprep.subr.bf16.mxu1 %v5561_v55  ;;  %v5579_v10 = vld [vmem:[%s5969_s19 + $0xa0] sm:$0xff]   ;;  %v5582_v13 = vld [vmem:[%s5969_s19 + $0x28] sm:$0xff]   ;;  %v5584_v15 = vld [vmem:[%s5969_s19 + $0x70] sm:$0xff]  }
0x1338   : > { %v5583_v14 = vld [vmem:[%s5969_s19 + $0xa8] sm:$0xff]   ;;  %v5585_v16 = vld [vmem:[%s5969_s19 + $0xf0] sm:$0xff]   ;;  %v5588_v63 = vld [vmem:[%s5969_s19 + $0x78] sm:$0xff]  }
0x1339   : > { %4671 = vmatmul.mubr.msk.bf16.vlgmr.msra.gmra.mrb[0].mxu0 %vm3652_vm9, %v3557_v53  ;;  %4672 = vmatmul.mubr.msk.bf16.vlgmr.msra.gmra.mrb[0].mxu1 %vm3652_vm9, %v3557_v53  ;;  %v5586_v62 = vld [vmem:[%s5969_s19 + $0x30] sm:$0xff]   ;;  %v5589_v19 = vld [vmem:[%s5969_s19 + $0xf8] sm:$0xff]   ;;  %v3570_v24 = vld [vmem:[%s1101_s7] sm:$0xf] }
0x133a   : > { %4873 = vmatpush3.bf16.msra.mxu0 %v5562_v56  ;;  %4895 = vmatpush3.bf16.msra.mxu1 %v5563_v57  ;;  %v5587_v17 = vld [vmem:[%s5969_s19 + $0xb0] sm:$0xff]   ;;  %v5590_v20 = vld [vmem:[%s5969_s19 + $0x38] sm:$0xff]   ;;  %v3575_v28 = vrot.slane %v3570_v24, %v3574_v22  ;;  %v3583_v29 = vrot.slane %v3570_v24, %v3582_v23  ;;  %v3579_v30 = vrot.slane %v3570_v24, %v3578_v25 }
0x133b   : > { %4874 = vmatprep.subr.bf16.mxu0 %v5564_v58  ;;  %4896 = vmatprep.subr.bf16.mxu1 %v5565_v59  ;;  %v5591_v18 = vld [vmem:[%s5969_s19 + $0xb8] sm:$0xff]   ;;  %v3587_v35 = vrot.slane %v3570_v24, %v3586_v27 }
0x133e   : > { %4875 = vmatpush3.bf16.msra.mxu0 %v5566_v60  ;;  %4897 = vmatpush3.bf16.msra.mxu1 %v5567_v61 }
0x133f   : > { %4876 = vmatprep.subr.bf16.mxu0 %v5568_v0  ;;  %4898 = vmatprep.subr.bf16.mxu1 %v5569_v1 }
0x1342   : > { %4877 = vmatpush3.bf16.msra.mxu0 %v5570_v2  ;;  %4899 = vmatpush3.bf16.msra.mxu1 %v5571_v3 }
0x1343   : > { %4878 = vmatprep.subr.bf16.mxu0 %v5572_v4  ;;  %4900 = vmatprep.subr.bf16.mxu1 %v5573_v5 }
0x1346   : > { %4879 = vmatpush3.bf16.msra.mxu0 %v5574_v6  ;;  %4901 = vmatpush3.bf16.msra.mxu1 %v5575_v7 }
0x1347   : > { %4880 = vmatprep.subr.bf16.mxu0 %v5576_v8  ;;  %4902 = vmatprep.subr.bf16.mxu1 %v5577_v34 }
0x134a   : > { %4881 = vmatpush3.bf16.msra.mxu0 %v5578_v9  ;;  %4903 = vmatpush3.bf16.msra.mxu1 %v5579_v10 }
0x134b   : > { %4882 = vmatprep.subr.bf16.mxu0 %v5580_v11  ;;  %4904 = vmatprep.subr.bf16.mxu1 %v5581_v12 }
0x134e   : > { %4883 = vmatpush3.bf16.msra.mxu0 %v5582_v13  ;;  %4905 = vmatpush3.bf16.msra.mxu1 %v5583_v14 }
0x134f   : > { %4884 = vmatprep.subr.bf16.mxu0 %v5584_v15  ;;  %4906 = vmatprep.subr.bf16.mxu1 %v5585_v16 }
0x1352   : > { %4885 = vmatpush3.bf16.msra.mxu0 %v5586_v62  ;;  %4907 = vmatpush3.bf16.msra.mxu1 %v5587_v17 }
0x1353   : > { %4886 = vmatprep.subr.bf16.mxu0 %v5588_v63  ;;  %4908 = vmatprep.subr.bf16.mxu1 %v5589_v19 }
0x1356   : > { %4887 = vmatpush3.bf16.msra.mxu0 %v5590_v20  ;;  %4909 = vmatpush3.bf16.msra.mxu1 %v5591_v18 }
0x140c   : > { %v3690_v31 = vpop.f32.mrb[0].mxu0  ;;  %v3733_v32 = vpop.f32.mrb[0].mxu1 }
0x140d   : > { %v6373_v33 = vadd.f32 %v3690_v31, %v3575_v28  ;;  %v6375_v36 = vadd.f32 %v3733_v32, %v3583_v29  ;;  %v3692_v37 = vpop.f32.mrb[1].mxu0  ;;  %v3735_v38 = vpop.f32.mrb[1].mxu1 }
0x140e   : > { %v6377_v39 = vadd.f32 %v3692_v37, %v3579_v30  ;;  %v6379_v40 = vadd.f32 %v3735_v38, %v3587_v35  ;;  %v3694_v41 = vpop.f32.mrb[2].mxu0  ;;  %v3737_v42 = vpop.f32.mrb[2].mxu1 }
0x140f   : > { %v3750_v43 = vmul.f32 0.044715, %v6373_v33  ;;  %v3752_v50 = vmul.f32 0.044715, %v6375_v36  ;;  %v3695_v44 = vadd.f32 %v3694_v41, %v3575_v28  ;;  %v3738_v48 = vadd.f32 %v3737_v42, %v3583_v29  ;;  %v3696_v45 = vpop.f32.mrb[3].mxu0  ;;  %v3739_v46 = vpop.f32.mrb[3].mxu1 }
0x1410   : > { %v3751_v47 = vmul.f32 0.044715, %v6377_v39  ;;  %v3753_v49 = vmul.f32 0.044715, %v6379_v40  ;;  %v6385_v51 = vadd.f32 %v3696_v45, %v3579_v30  ;;  %v6387_v52 = vadd.f32 %v3739_v46, %v3587_v35 }
0x1411   : > { %v3758_v53 = vmul.f32 %v3750_v43, %v6373_v33  ;;  %v3760_v54 = vmul.f32 %v3752_v50, %v6375_v36  ;;  %v3754_v55 = vmul.f32 0.044715, %v3695_v44  ;;  %v3756_v56 = vmul.f32 0.044715, %v3738_v48 }
0x1412   : > { %v3759_v57 = vmul.f32 %v3751_v47, %v6377_v39  ;;  %v3761_v58 = vmul.f32 %v3753_v49, %v6379_v40  ;;  %v3755_v59 = vmul.f32 0.044715, %v6385_v51  ;;  %v3757_v60 = vmul.f32 0.044715, %v6387_v52 }
0x1413   : > { %v3766_v61 = vmul.f32 %v3758_v53, %v6373_v33  ;;  %v3768_v0 = vmul.f32 %v3760_v54, %v6375_v36  ;;  %v3762_v1 = vmul.f32 %v3754_v55, %v3695_v44  ;;  %v3764_v2 = vmul.f32 %v3756_v56, %v3738_v48 }
0x1414   : > { %v3767_v3 = vmul.f32 %v3759_v57, %v6377_v39  ;;  %v3769_v4 = vmul.f32 %v3761_v58, %v6379_v40  ;;  %v3763_v5 = vmul.f32 %v3755_v59, %v6385_v51  ;;  %v3765_v6 = vmul.f32 %v3757_v60, %v6387_v52 }
0x1415   : > { %v3774_v7 = vadd.f32 %v3766_v61, %v6373_v33  ;;  %v3776_v8 = vadd.f32 %v3768_v0, %v6375_v36  ;;  %v3770_v34 = vmul.f32 %v3762_v1, %v3695_v44  ;;  %v3772_v9 = vmul.f32 %v3764_v2, %v3738_v48 }
0x1416   : > { %v3771_v10 = vmul.f32 %v3763_v5, %v6385_v51  ;;  %v3773_v11 = vmul.f32 %v3765_v6, %v6387_v52  ;;  %v3775_v16 = vadd.f32 %v3767_v3, %v6377_v39  ;;  %v3777_v19 = vadd.f32 %v3769_v4, %v6379_v40 }
0x1417   : > { %v3782_v12 = vmul.f32 0.7978846, %v3774_v7  ;;  %v3784_v13 = vmul.f32 0.7978846, %v3776_v8  ;;  %v3778_v14 = vadd.f32 %v3770_v34, %v3695_v44  ;;  %v3780_v15 = vadd.f32 %v3772_v9, %v3738_v48  ;;  %v3814_v34 = vld [vmem:[#allocation4] sm:$0xff] }
0x1418   : > { %v3779_v62 = vadd.f32 %v3771_v10, %v6385_v51  ;;  %v3783_v20 = vmul.f32 0.7978846, %v3775_v16  ;;  %v3781_v26 = vadd.f32 %v3773_v11, %v6387_v52  ;;  %v3785_v21 = vmul.f32 0.7978846, %v3777_v19 }
0x1419   : > { %5592 = vtanh.f32 %v3782_v12  ;;  %v3786_v17 = vmul.f32 0.7978846, %v3778_v14  ;;  %v3788_v63 = vmul.f32 0.7978846, %v3780_v15  ;;  %v3742_v30 = vmul.f32 0.5, %v6373_v33  ;;  %v3815_v12 = vld [vmem:[#allocation4 + $0x8] sm:$0xff] }
0x141a   : > { %5594 = vtanh.f32 %v3784_v13  ;;  %v3787_v18 = vmul.f32 0.7978846, %v3779_v62  ;;  %v3789_v22 = vmul.f32 0.7978846, %v3781_v26  ;;  %v3746_v35 = vmul.f32 0.5, %v3695_v44 }
0x141b   : > { %5596 = vtanh.f32 %v3786_v17  ;;  %v3744_v37 = vmul.f32 0.5, %v6375_v36  ;;  %v3748_v38 = vmul.f32 0.5, %v3738_v48  ;;  %v3743_v43 = vmul.f32 0.5, %v6377_v39  ;;  %v4706_v62 = vld [vmem:[%s1115_s30] ss:$0 sm:$0xff] (!%p4705_p5)  ;;  %v4176_v17 = vld [vmem:[#allocation3] sm:$0xff] (!%p4705_p5) }
0x141c   : > { %5598 = vtanh.f32 %v3788_v63  ;;  %v3747_v49 = vmul.f32 0.5, %v6385_v51  ;;  %v3745_v44 = vmul.f32 0.5, %v6379_v40  ;;  %v3749_v56 = vmul.f32 0.5, %v6387_v52 }
0x141d   : > { %5600 = vtanh.f32 %v3783_v20  ;;  %v4177_v20 = vld [vmem:[#allocation3 + $0x8] sm:$0xff] (!%p4705_p5) }
0x141e   : > { %5602 = vtanh.f32 %v3787_v18 }
0x141f   : > { %5604 = vtanh.f32 %v3785_v21 }
0x1420   : > { %5606 = vtanh.f32 %v3789_v22 }
0x1423   : > { %v5593_v23 = vpop.eup %5592 }
0x1424   : > { %v5595_v24 = vpop.eup %5594  ;;  %v3798_v25 = vadd.f32 1.0, %v5593_v23 }
0x1425   : > { %v5597_v27 = vpop.eup %5596  ;;  %v3800_v28 = vadd.f32 1.0, %v5595_v24 }
0x1426   : > { %v5599_v29 = vpop.eup %5598  ;;  %v3802_v31 = vadd.f32 1.0, %v5597_v27  ;;  %v3806_v45 = vmul.f32 %v3798_v25, %v3742_v30 }
0x1427   : > { %v5601_v32 = vpop.eup %5600  ;;  %v3804_v41 = vadd.f32 1.0, %v5599_v29  ;;  %v3808_v54 = vmul.f32 %v3800_v28, %v3744_v37 }
0x1428   : > { %v5603_v42 = vpop.eup %5602  ;;  %v3799_v50 = vadd.f32 1.0, %v5601_v32  ;;  %v3810_v46 = vmul.f32 %v3802_v31, %v3746_v35 }
0x1429   : > { %v5605_v47 = vpop.eup %5604  ;;  %v3803_v53 = vadd.f32 1.0, %v5603_v42  ;;  %v3812_v55 = vmul.f32 %v3804_v41, %v3748_v38 }
0x142a   : > { %v5607_v33 = vpop.eup %5606  ;;  %v3801_v36 = vadd.f32 1.0, %v5605_v47  ;;  %v3816_v48 = vpack.c.bf16 %v3810_v46, %v3806_v45  ;;  %v3807_v57 = vmul.f32 %v3799_v50, %v3743_v43  ;;  %v4707_v47 = vld [vmem:[%s1118_s14] ss:$0 sm:$0xff] (!%p4705_p5) }
0x142b   : > { %v3811_v58 = vmul.f32 %v3803_v53, %v3747_v49  ;;  %v3805_v59 = vadd.f32 1.0, %v5607_v33  ;;  %v3818_v39 = vpack.c.bf16 %v3812_v55, %v3808_v54  ;;  %v4708_v53 = vld [vmem:[%s1121_s12] ss:$0 sm:$0xff] (!%p4705_p5) }
0x142c   : > { %v3809_v61 = vmul.f32 %v3801_v36, %v3745_v44 }
0x142d   : > { %v3817_v60 = vpack.c.bf16 %v3811_v58, %v3807_v57  ;;  %v3813_v0 = vmul.f32 %v3805_v59, %v3749_v56 }
0x142f   : > { %4108 = vmatprep.mubr.bf16.mxu0 %v3817_v60  ;;  %v3819_v1 = vpack.c.bf16 %v3813_v0, %v3809_v61 }
0x1430   : > { %4109 = vmatmul.mubr.bf16.vlgmr.msra.gmra.mrb[4].mxu0 %v3816_v48 }
0x1431   : > { %4149 = vmatprep.mubr.bf16.mxu1 %v3819_v1 }
0x1432   : > { %4150 = vmatmul.mubr.bf16.vlgmr.msra.gmra.mrb[4].mxu1 %v3818_v39 }
0x1503   : > { %v4888_v51 = vpop.f32.mrb[4].mxu0 }
0x1504   : > { %v4889_v2 = vpop.f32.mrb[5].mxu0 }
0x1505   : > { %v4910_v3 = vpop.f32.mrb[4].mxu1  ;;  %v4890_v40 = vadd.f32 %v4889_v2, %v4888_v51  ;;  %v4891_v4 = vpop.f32.mrb[6].mxu0 }
0x1506   : > { %v4911_v52 = vpop.f32.mrb[5].mxu1  ;;  %v4892_v5 = vpop.f32.mrb[7].mxu0 }
0x1507   : > { %v4912_v6 = vadd.f32 %v4911_v52, %v4910_v3  ;;  %v4913_v7 = vpop.f32.mrb[6].mxu1  ;;  %v4893_v8 = vadd.f32 %v4892_v5, %v4891_v4 }
0x1508   : > { %v4914_v9 = vpop.f32.mrb[7].mxu1 }
0x1509   : > { %v4152_v10 = vadd.f32 %v4912_v6, %v4890_v40  ;;  %v4915_v11 = vadd.f32 %v4914_v9, %v4913_v7  ;;  %4164 = sbr.rel (%p4705_p5) target bundleno = 5719 (0x1657), region = 159 }
0x150b   : > { %v4158_v13 = vadd.f32 %v4152_v10, %v3814_v34  ;;  %v4155_v14 = vadd.f32 %v4915_v11, %v4893_v8 }
0x150d   : > { %4160 = vst.msk [vmem:[#allocation4] sm:$0xff] %vm3652_vm9, %v4158_v13  ;;  %v4159_v15 = vadd.f32 %v4155_v14, %v3815_v12 }
0x150f   : > { %4161 = vst.msk [vmem:[#allocation4 + $0x8] sm:$0xff] %vm3652_vm9, %v4159_v15 }
0x1514   : > { %v4165_v16 = vld [vmem:[#allocation4] sm:$0xff] }
0x1515   : > { %v4174_v63 = vadd.f32 %v4706_v62, %v4165_v16 }
0x1516   : > { %v4166_v19 = vld [vmem:[#allocation4 + $0x8] sm:$0xff] }
0x1517   : > { %v4175_v18 = vadd.f32 %v4706_v62, %v4166_v19  ;;  %v4178_v26 = vadd.f32 %v4176_v17, %v4174_v63 }
0x1519   : > { %v4179_v21 = vadd.f32 %v4177_v20, %v4175_v18  ;;  %v4182_v22 = vsel %vm3652_vm9, %v4178_v26, 0.0 }
0x151a   : > { %4183 = vadd.xlane.f32.xlu0 %v4182_v22 }
0x151b   : > { %v4185_v23 = vsel %vm3652_vm9, %v4179_v21, 0.0 }
0x151e   : > { %4186 = vadd.xlane.f32.xlu0 %v4185_v23 }
0x15a7   : > { %v4184_v24 = vpop.xlane.xlu0 %4183 }
0x15a8   : > { %v4189_v25 = vmul.f32 0.020833334, %v4184_v24 }
0x15aa   : > { %v4191_v27 = vsub.f32 %v4178_v26, %v4189_v25 }
0x15ab   : > { %v4187_v28 = vpop.xlane.xlu0 %4186 }
0x15ac   : > { %v4190_v29 = vmul.f32 0.020833334, %v4187_v28  ;;  %v4193_v30 = vmul.f32 %v4191_v27, %v4191_v27 }
0x15ae   : > { %v4192_v35 = vsub.f32 %v4179_v21, %v4190_v29  ;;  %v4195_v31 = vsel %vm3652_vm9, %v4193_v30, 0.0 }
0x15af   : > { %4196 = vadd.xlane.f32.xlu1 %v4195_v31 }
0x15b0   : > { %v4194_v32 = vmul.f32 %v4192_v35, %v4192_v35 }
0x15b2   : > { %v4198_v37 = vsel %vm3652_vm9, %v4194_v32, 0.0 }
0x15b3   : > { %4199 = vadd.xlane.f32.xlu1 %v4198_v37 }
0x163c   : > { %v4197_v38 = vpop.xlane.xlu1 %4196 }
0x163d   : > { %v4201_v41 = vmul.f32 0.020833334, %v4197_v38 }
0x163f   : > { %v4203_v42 = vadd.f32 1e-12, %v4201_v41 }
0x1640   : > { %v4200_v43 = vpop.xlane.xlu1 %4199 }
0x1641   : > { %5608 = vrsqrt.f32 %v4203_v42  ;;  %v4202_v50 = vmul.f32 0.020833334, %v4200_v43 }
0x1643   : > { %v4204_v45 = vadd.f32 1e-12, %v4202_v50 }
0x1645   : > { %5610 = vrsqrt.f32 %v4204_v45 }
0x164b   : > { %v5609_v46 = vpop.eup %5608 }
0x164c   : > { %v4207_v49 = vmul.f32 %v5609_v46, %v4191_v27 }
0x164e   : > { %v4215_v54 = vmul.f32 %v4707_v47, %v4207_v49 }
0x164f   : > { %v5611_v55 = vpop.eup %5610 }
0x1650   : > { %v4223_v33 = vadd.f32 %v4708_v53, %v4215_v54  ;;  %v4208_v44 = vmul.f32 %v5611_v55, %v4192_v35 }
0x1652   : > { %4225 = vst.msk [vmem:[#allocation2] sm:$0xff] %vm3652_vm9, %v4223_v33  ;;  %v4216_v56 = vmul.f32 %v4707_v47, %v4208_v44 }
0x1654   : > { %v4224_v36 = vadd.f32 %v4708_v53, %v4216_v56 }
0x1656   : > { %4226 = vst.msk [vmem:[#allocation2 + $0x8] sm:$0xff] %vm3652_vm9, %v4224_v36 }
0x1657 PF: > { %p4227_p6 = pnand %p1124_p0, %p1123_p13 }
0x1658   : > { %s6592_s12 = sld [smem:[#allocation40_spill]] (!%p4227_p6)  ;;  %v4710_v0 = vld [vmem:[#allocation5] ss:$0 sm:$0xff] (!%p4227_p6)  ;;  %vm4269_vm10 = vcmask (!%p4227_p6), 7168   ;;  %s6593_s3 = sld [smem:[#allocation41_spill]] (!%p4227_p6) }
0x1659   : > { %4230 = sbr.rel (%p4227_p6) target bundleno = 5905 (0x1711), region = 163  ;;  %v4231_v48 = vld [vmem:[#allocation2] sm:$0xff] (!%p4227_p6) }
0x165d   : > { %v4232_v58 = vld [vmem:[#allocation2 + $0x8] sm:$0xff] (!%p4227_p6) }
0x165e   : > { %v4709_v57 = vld [vmem:[%s6592_s12] ss:$0 sm:$0xff] (!%p4227_p6) }
0x165f   : > { %v4240_v59 = vmul.f32 (!%p4227_p6), %v4709_v57, %v4231_v48  ;;  %v4241_v39 = vmul.f32 (!%p4227_p6), %v4709_v57, %v4232_v58 }
0x1661   : > { %v4242_v60 = vsel %vm3652_vm9, %v4240_v59, 0.0  ;;  %v4245_v61 = vsel %vm3652_vm9, %v4241_v39, 0.0 }
0x1662   : > { %4243 = vadd.xlane.f32.xlu0 %v4242_v60 }
0x1666   : > { %4246 = vadd.xlane.f32.xlu0 %v4245_v61 }
0x16ef   : > { %v4244_v1 = vpop.xlane.xlu0 %4243 }
0x16f0   : > { %v4255_v51 = vadd.f32 %v4710_v0, %v4244_v1 }
0x16f2   : > { %v4711_v2 = vmul.f32 -1.442695, %v4255_v51 }
0x16f3   : > { %v4247_v3 = vpop.xlane.xlu0 %4246 }
0x16f4   : > { %5612 = vpow2.f32 %v4711_v2  ;;  %v4256_v40 = vadd.f32 %v4710_v0, %v4247_v3 }
0x16f6   : > { %v4712_v4 = vmul.f32 -1.442695, %v4256_v40 }
0x16f8   : > { %5614 = vpow2.f32 %v4712_v4 }
0x16fe   : > { %v5613_v52 = vpop.eup %5612 }
0x16ff   : > { %v4263_v5 = vadd.f32 1.0, %v5613_v52 }
0x1701   : > { %5616 = vrcp.f32 %v4263_v5 }
0x1702   : > { %v5615_v6 = vpop.eup %5614 }
0x1703   : > { %v4264_v7 = vadd.f32 1.0, %v5615_v6 }
0x1705   : > { %5618 = vrcp.f32 %v4264_v7 }
0x170b   : > { %v5617_v8 = vpop.eup %5616 }
0x170c   : > { %4270 = vst.msk [vmem:[%s6593_s3] sm:$0xff] %vm4269_vm10, %v5617_v8 }
0x170f   : > { %v5619_v34 = vpop.eup %5618 }
0x1710   : > { %4271 = vst.msk [vmem:[%s6593_s3 + $0x8] sm:$0xff] %vm4269_vm10, %v5619_v34 }
0x1711 PF: > { %s6594_s23 = sld [smem:[#allocation10_spill]]  ;;  %s6595_s7 = sld [smem:[#allocation7_spill]] }
0x1712   : > { %s6596_s28 = sld [smem:[#allocation13_spill]]  ;;  %s6597_s8 = sld [smem:[#allocation8_spill]] }
0x1713   : > { %s6598_s4 = sld [smem:[#allocation9_spill]]  ;;  %s6599_s29 = sld [smem:[#allocation11_spill]] }
0x1714   : > { %s6600_s0 = sld [smem:[#allocation12_spill]] }
0x1717   : > { %s38_s9 = sadd.s32 1, %s6594_s23  }
0x1718   : > { %p35_p7 = scmp.ge.s32.totalorder %s38_s9, 14  }
0x171a   :  { %37 = sbr.rel (!%p35_p7) target bundleno = 31 (0x1f), region = 260 }

</bundles_post_ra>
